<compile_context>
chip_gen: v7x
topology: tpu7x:2x2x1
jax: 0.10.0
libtpu: 0.0.40
codegen_flags: <defaults>
</compile_context>

<pallas_src>
import jax
import jax.numpy as jnp
import numpy as np
from jax import lax
from jax.experimental import pallas as pl
from jax.experimental.pallas import tpu as pltpu

# ---- synthetic TrainArgs (small shapes) ----
HIDDEN = 32                      # hidden_size
NUM_HEADS = 8                    # num_heads (>= 6 so adj/dist/coulomb heads all exist)
RET = HIDDEN // NUM_HEADS        # ret_size = 4
SCALE_F = RET ** (-0.5)          # scale_factor
GAMMA = 1.0 - 2.0 ** (-5)        # gamma
DECAY = GAMMA ** SCALE_F         # gamma ** scale_factor (scalar multiplier on ret_a_w)
F_SCALE = 0.5                    # f_scale
EPS = 1e-5                       # LayerNorm eps
N_ATOMS = 24                     # atoms in the molecule

assert NUM_HEADS >= 6, "heads 0..5 receive adjacency / distance / coulomb features"


def _softmax_rows(m):
    """softmax(m, dim=1) as used for normalize_matrices=True."""
    m = m - jnp.max(m, axis=1, keepdims=True)
    e = jnp.exp(m)
    return e / jnp.sum(e, axis=1, keepdims=True)


def atom_retention_kernel(x_ref, wqkv_ref, wo_ref, bo_ref, lnw_ref, lnb_ref,
                          feat_ref, mol_ref, rw_ref):
    x = x_ref[...]                                              # (N, H)
    # Fused QKV projection: one MXU matmul instead of three.
    qkv = jnp.dot(x, wqkv_ref[...],
                  preferred_element_type=jnp.float32)           # (N, 3H)
    q = qkv[:, :HIDDEN]
    k = qkv[:, HIDDEN:2 * HIDDEN]
    v = qkv[:, 2 * HIDDEN:]

    adj = feat_ref[0]                                           # (N, N)
    dist = _softmax_rows(feat_ref[1])                           # normalize_matrices=True
    clb = _softmax_rows(feat_ref[2])
    feat_add = [adj, adj, dist, dist, clb, clb] + [None] * (NUM_HEADS - 6)

    wo = wo_ref[...]                                            # (H, H)
    acc = jnp.zeros((N_ATOMS, HIDDEN), jnp.float32)             # sum_h ReLU(h_out) @ W_o[h]
    rw_sum = jnp.zeros((N_ATOMS, N_ATOMS), jnp.float32)         # for mean(ret_a_w, axis=0)

    for h in range(NUM_HEADS):                                  # unrolled per-head retention
        sl = slice(h * RET, (h + 1) * RET)
        qh, kh, vh = q[:, sl], k[:, sl], v[:, sl]               # (N, d)
        # q_h @ k_h.T without an explicit transpose (contract last dim with last dim).
        ret_w = lax.dot_general(qh, kh, (((1,), (1,)), ((), ())),
                                preferred_element_type=jnp.float32)   # (N, N)
        if feat_add[h] is not None:
            ret_w = ret_w + F_SCALE * feat_add[h]
        ret_w = ret_w * DECAY                                   # * gamma ** scale_factor
        rw_sum = rw_sum + ret_w
        head = jnp.maximum(                                     # activation = ReLU
            jnp.dot(ret_w, vh, preferred_element_type=jnp.float32), 0.0)      # (N, d)
        # Accumulate this head straight through its slice of W_o (no lane concat).
        acc = acc + jnp.dot(head, wo[sl, :], preferred_element_type=jnp.float32)

    y = x + acc + bo_ref[...]                                   # residual + W_a_o bias
    # LayerNorm(hidden_size), elementwise affine — vectorized over the whole tile.
    mu = jnp.mean(y, axis=1, keepdims=True)
    var = jnp.mean((y - mu) ** 2, axis=1, keepdims=True)
    yn = (y - mu) * lax.rsqrt(var + EPS)
    mol_ref[...] = yn * lnw_ref[...] + lnb_ref[...]
    rw_ref[...] = rw_sum * (1.0 / NUM_HEADS)                    # mean(ret_a_w, axis=0)


def multi_atom_retention(x, wq, wk, wv, wo, bo, ln_w, ln_b, adj, dist, clb):
    """x: (N_ATOMS, HIDDEN) f32 -> (mol_vec (N, H), ret_w_mean (N, N))."""
    wqkv = jnp.concatenate([wq, wk, wv], axis=1)                # (H, 3H) fused weight
    feat = jnp.stack([adj, dist, clb]).astype(jnp.float32)      # (3, N, N)
    vmem = pl.BlockSpec(memory_space=pltpu.MemorySpace.VMEM)    # whole array, VMEM-resident
    mol, rw_mean = pl.pallas_call(
        atom_retention_kernel,
        out_shape=(jax.ShapeDtypeStruct((N_ATOMS, HIDDEN), jnp.float32),
                   jax.ShapeDtypeStruct((N_ATOMS, N_ATOMS), jnp.float32)),
        in_specs=[vmem] * 7,
        out_specs=(vmem, vmem),
    )(x, wqkv, wo,
      bo.reshape(1, HIDDEN).astype(jnp.float32),
      ln_w.reshape(1, HIDDEN).astype(jnp.float32),
      ln_b.reshape(1, HIDDEN).astype(jnp.float32),
      feat)
    return mol, rw_mean


def reference(x, wq, wk, wv, wo, bo, ln_w, ln_b, adj, dist, clb):
    """Pure-JAX transcription of the PyTorch forward (eval mode, default precision)."""
    n = x.shape[0]
    q = (x @ wq).reshape(n, NUM_HEADS, RET).transpose(1, 0, 2)   # (h, n, d)
    k = (x @ wk).reshape(n, NUM_HEADS, RET).transpose(1, 2, 0)   # (h, d, n)
    v = (x @ wv).reshape(n, NUM_HEADS, RET).transpose(1, 0, 2)   # (h, n, d)
    w = jnp.matmul(q, k)                                         # (h, n, n)
    dist_sm = _softmax_rows(dist)
    clb_sm = _softmax_rows(clb)
    w = w.at[0].add(F_SCALE * adj)
    w = w.at[1].add(F_SCALE * adj)
    w = w.at[2].add(F_SCALE * dist_sm)
    w = w.at[3].add(F_SCALE * dist_sm)
    w = w.at[4].add(F_SCALE * clb_sm)
    w = w.at[5].add(F_SCALE * clb_sm)
    w = w * DECAY
    h = jnp.maximum(jnp.matmul(w, v), 0.0)                       # ReLU
    h = h.transpose(1, 0, 2).reshape(n, HIDDEN)
    y = x + (h @ wo + bo)
    mu = y.mean(axis=-1, keepdims=True)
    var = ((y - mu) ** 2).mean(axis=-1, keepdims=True)
    yn = (y - mu) * lax.rsqrt(var + EPS)
    return yn * ln_w + ln_b, w.mean(axis=0)


if __name__ == "__main__":
    key = jax.random.PRNGKey(0)
    ks = jax.random.split(key, 11)
    # TODO(synk): viz_dir visualization side-effects and the per-flag (adjacency /
    # distance / coulomb) toggling are not expressed; all three are assumed enabled.
    x = 0.5 * jax.random.normal(ks[0], (N_ATOMS, HIDDEN), jnp.float32)
    init = 1.0 / np.sqrt(HIDDEN)
    wq = init * jax.random.normal(ks[1], (HIDDEN, HIDDEN), jnp.float32)
    wk = init * jax.random.normal(ks[2], (HIDDEN, HIDDEN), jnp.float32)
    wv = init * jax.random.normal(ks[3], (HIDDEN, HIDDEN), jnp.float32)
    wo = init * jax.random.normal(ks[4], (HIDDEN, HIDDEN), jnp.float32)
    bo = 0.1 * jax.random.normal(ks[5], (HIDDEN,), jnp.float32)
    ln_w = 1.0 + 0.1 * jax.random.normal(ks[6], (HIDDEN,), jnp.float32)
    ln_b = 0.1 * jax.random.normal(ks[7], (HIDDEN,), jnp.float32)
    adj = jax.random.bernoulli(ks[8], 0.3, (N_ATOMS, N_ATOMS)).astype(jnp.float32)
    dist = jnp.abs(jax.random.normal(ks[9], (N_ATOMS, N_ATOMS), jnp.float32))
    clb = jax.random.normal(ks[10], (N_ATOMS, N_ATOMS), jnp.float32)

    mol, rw = multi_atom_retention(x, wq, wk, wv, wo, bo, ln_w, ln_b, adj, dist, clb)
    mol = jax.block_until_ready(mol)
    rw = jax.block_until_ready(rw)
    mol_ref, rw_ref = reference(x, wq, wk, wv, wo, bo, ln_w, ln_b, adj, dist, clb)
    mol_ref = jax.block_until_ready(mol_ref)
    rw_ref = jax.block_until_ready(rw_ref)

    assert mol.shape == (N_ATOMS, HIDDEN) and rw.shape == (N_ATOMS, N_ATOMS)
    np.testing.assert_allclose(np.asarray(mol), np.asarray(mol_ref), rtol=1e-2, atol=1e-2)
    np.testing.assert_allclose(np.asarray(rw), np.asarray(rw_ref), rtol=1e-2, atol=1e-2)
    print("KERNEL_OK")
</pallas_src>

<mosaic_0001>
module attributes {stable_mosaic.version = 11 : i64} {
  func.func @atom_retention_kernel(%arg0: memref<24x32xf32, #tpu.memory_space<vmem>>, %arg1: memref<32x96xf32, #tpu.memory_space<vmem>>, %arg2: memref<32x32xf32, #tpu.memory_space<vmem>>, %arg3: memref<1x32xf32, #tpu.memory_space<vmem>>, %arg4: memref<1x32xf32, #tpu.memory_space<vmem>>, %arg5: memref<1x32xf32, #tpu.memory_space<vmem>>, %arg6: memref<3x24x24xf32, #tpu.memory_space<vmem>>, %arg7: memref<24x32xf32, #tpu.memory_space<vmem>>, %arg8: memref<24x24xf32, #tpu.memory_space<vmem>>) attributes {dimension_semantics = [], scalar_prefetch = 0 : i64, scratch_operands = 0 : i64, tpu.core_type = #tpu.core_type<tc>} {
    %c0 = arith.constant 0 : index
    %c0_0 = arith.constant 0 : index
    %0 = vector.load %arg0[%c0, %c0_0] : memref<24x32xf32, #tpu.memory_space<vmem>>, vector<24x32xf32>
    %c0_1 = arith.constant 0 : index
    %c0_2 = arith.constant 0 : index
    %1 = vector.load %arg1[%c0_1, %c0_2] : memref<32x96xf32, #tpu.memory_space<vmem>>, vector<32x96xf32>
    %cst = arith.constant dense<0.000000e+00> : vector<24x96xf32>
    %2 = tpu.matmul %0, %1, %cst {dimension_numbers = #tpu.dot_dimension_numbers<[1], [0], [0], [1], [0, 0, 1, 1], [], []>} : vector<24x32xf32>, vector<32x96xf32>, vector<24x96xf32> -> vector<24x96xf32>
    %3 = vector.extract_strided_slice %2 {offsets = [0, 0], sizes = [24, 32], strides = [1, 1]} : vector<24x96xf32> to vector<24x32xf32>
    %4 = vector.extract_strided_slice %2 {offsets = [0, 32], sizes = [24, 32], strides = [1, 1]} : vector<24x96xf32> to vector<24x32xf32>
    %5 = vector.extract_strided_slice %2 {offsets = [0, 64], sizes = [24, 32], strides = [1, 1]} : vector<24x96xf32> to vector<24x32xf32>
    %c0_3 = arith.constant 0 : index
    %c0_4 = arith.constant 0 : index
    %c0_5 = arith.constant 0 : index
    %6 = vector.load %arg6[%c0_3, %c0_4, %c0_5] : memref<3x24x24xf32, #tpu.memory_space<vmem>>, vector<1x24x24xf32>
    %7 = vector.shape_cast %6 : vector<1x24x24xf32> to vector<24x24xf32>
    %c1 = arith.constant 1 : index
    %c0_6 = arith.constant 0 : index
    %c0_7 = arith.constant 0 : index
    %8 = vector.load %arg6[%c1, %c0_6, %c0_7] : memref<3x24x24xf32, #tpu.memory_space<vmem>>, vector<1x24x24xf32>
    %9 = vector.shape_cast %8 : vector<1x24x24xf32> to vector<24x24xf32>
    %cst_8 = arith.constant dense<0xFF800000> : vector<24xf32>
    %10 = vector.multi_reduction <maximumf>, %9, %cst_8 [1] : vector<24x24xf32> to vector<24xf32>
    %11 = vector.shape_cast %10 : vector<24xf32> to vector<24x1xf32>
    %12 = vector.broadcast %11 : vector<24x1xf32> to vector<24x24xf32>
    %13 = arith.subf %9, %12 : vector<24x24xf32>
    %14 = math.exp %13 : vector<24x24xf32>
    %cst_9 = arith.constant dense<0.000000e+00> : vector<24xf32>
    %15 = vector.multi_reduction <add>, %14, %cst_9 [1] : vector<24x24xf32> to vector<24xf32>
    %16 = vector.shape_cast %15 : vector<24xf32> to vector<24x1xf32>
    %17 = vector.broadcast %16 : vector<24x1xf32> to vector<24x24xf32>
    %18 = arith.divf %14, %17 : vector<24x24xf32>
    %c2 = arith.constant 2 : index
    %c0_10 = arith.constant 0 : index
    %c0_11 = arith.constant 0 : index
    %19 = vector.load %arg6[%c2, %c0_10, %c0_11] : memref<3x24x24xf32, #tpu.memory_space<vmem>>, vector<1x24x24xf32>
    %20 = vector.shape_cast %19 : vector<1x24x24xf32> to vector<24x24xf32>
    %cst_12 = arith.constant dense<0xFF800000> : vector<24xf32>
    %21 = vector.multi_reduction <maximumf>, %20, %cst_12 [1] : vector<24x24xf32> to vector<24xf32>
    %22 = vector.shape_cast %21 : vector<24xf32> to vector<24x1xf32>
    %23 = vector.broadcast %22 : vector<24x1xf32> to vector<24x24xf32>
    %24 = arith.subf %20, %23 : vector<24x24xf32>
    %25 = math.exp %24 : vector<24x24xf32>
    %cst_13 = arith.constant dense<0.000000e+00> : vector<24xf32>
    %26 = vector.multi_reduction <add>, %25, %cst_13 [1] : vector<24x24xf32> to vector<24xf32>
    %27 = vector.shape_cast %26 : vector<24xf32> to vector<24x1xf32>
    %28 = vector.broadcast %27 : vector<24x1xf32> to vector<24x24xf32>
    %29 = arith.divf %25, %28 : vector<24x24xf32>
    %c0_14 = arith.constant 0 : index
    %c0_15 = arith.constant 0 : index
    %30 = vector.load %arg2[%c0_14, %c0_15] : memref<32x32xf32, #tpu.memory_space<vmem>>, vector<32x32xf32>
    %cst_16 = arith.constant 0.000000e+00 : f32
    %31 = vector.broadcast %cst_16 : f32 to vector<24x32xf32>
    %cst_17 = arith.constant 0.000000e+00 : f32
    %32 = vector.broadcast %cst_17 : f32 to vector<24x24xf32>
    %33 = vector.extract_strided_slice %3 {offsets = [0, 0], sizes = [24, 4], strides = [1, 1]} : vector<24x32xf32> to vector<24x4xf32>
    %34 = vector.extract_strided_slice %4 {offsets = [0, 0], sizes = [24, 4], strides = [1, 1]} : vector<24x32xf32> to vector<24x4xf32>
    %35 = vector.extract_strided_slice %5 {offsets = [0, 0], sizes = [24, 4], strides = [1, 1]} : vector<24x32xf32> to vector<24x4xf32>
    %cst_18 = arith.constant dense<0.000000e+00> : vector<24x24xf32>
    %36 = tpu.matmul %33, %34, %cst_18 {dimension_numbers = #tpu.dot_dimension_numbers<[1], [1], [0], [0], [0, 0, 1, 0], [], []>} : vector<24x4xf32>, vector<24x4xf32>, vector<24x24xf32> -> vector<24x24xf32>
    %cst_19 = arith.constant 5.000000e-01 : f32
    %37 = vector.broadcast %cst_19 : f32 to vector<24x24xf32>
    %38 = arith.mulf %37, %7 : vector<24x24xf32>
    %39 = arith.addf %36, %38 : vector<24x24xf32>
    %cst_20 = arith.constant 0.984250962 : f32
    %40 = vector.broadcast %cst_20 : f32 to vector<24x24xf32>
    %41 = arith.mulf %39, %40 : vector<24x24xf32>
    %42 = arith.addf %32, %41 : vector<24x24xf32>
    %cst_21 = arith.constant dense<0.000000e+00> : vector<24x4xf32>
    %43 = tpu.matmul %41, %35, %cst_21 {dimension_numbers = #tpu.dot_dimension_numbers<[1], [0], [0], [1], [0, 0, 1, 1], [], []>} : vector<24x24xf32>, vector<24x4xf32>, vector<24x4xf32> -> vector<24x4xf32>
    %cst_22 = arith.constant 0.000000e+00 : f32
    %44 = vector.broadcast %cst_22 : f32 to vector<24x4xf32>
    %45 = arith.maximumf %43, %44 : vector<24x4xf32>
    %46 = vector.extract_strided_slice %30 {offsets = [0, 0], sizes = [4, 32], strides = [1, 1]} : vector<32x32xf32> to vector<4x32xf32>
    %cst_23 = arith.constant dense<0.000000e+00> : vector<24x32xf32>
    %47 = tpu.matmul %45, %46, %cst_23 {dimension_numbers = #tpu.dot_dimension_numbers<[1], [0], [0], [1], [0, 0, 1, 1], [], []>} : vector<24x4xf32>, vector<4x32xf32>, vector<24x32xf32> -> vector<24x32xf32>
    %48 = arith.addf %31, %47 : vector<24x32xf32>
    %49 = vector.extract_strided_slice %3 {offsets = [0, 4], sizes = [24, 4], strides = [1, 1]} : vector<24x32xf32> to vector<24x4xf32>
    %50 = vector.extract_strided_slice %4 {offsets = [0, 4], sizes = [24, 4], strides = [1, 1]} : vector<24x32xf32> to vector<24x4xf32>
    %51 = vector.extract_strided_slice %5 {offsets = [0, 4], sizes = [24, 4], strides = [1, 1]} : vector<24x32xf32> to vector<24x4xf32>
    %cst_24 = arith.constant dense<0.000000e+00> : vector<24x24xf32>
    %52 = tpu.matmul %49, %50, %cst_24 {dimension_numbers = #tpu.dot_dimension_numbers<[1], [1], [0], [0], [0, 0, 1, 0], [], []>} : vector<24x4xf32>, vector<24x4xf32>, vector<24x24xf32> -> vector<24x24xf32>
    %cst_25 = arith.constant 5.000000e-01 : f32
    %53 = vector.broadcast %cst_25 : f32 to vector<24x24xf32>
    %54 = arith.mulf %53, %7 : vector<24x24xf32>
    %55 = arith.addf %52, %54 : vector<24x24xf32>
    %cst_26 = arith.constant 0.984250962 : f32
    %56 = vector.broadcast %cst_26 : f32 to vector<24x24xf32>
    %57 = arith.mulf %55, %56 : vector<24x24xf32>
    %58 = arith.addf %42, %57 : vector<24x24xf32>
    %cst_27 = arith.constant dense<0.000000e+00> : vector<24x4xf32>
    %59 = tpu.matmul %57, %51, %cst_27 {dimension_numbers = #tpu.dot_dimension_numbers<[1], [0], [0], [1], [0, 0, 1, 1], [], []>} : vector<24x24xf32>, vector<24x4xf32>, vector<24x4xf32> -> vector<24x4xf32>
    %cst_28 = arith.constant 0.000000e+00 : f32
    %60 = vector.broadcast %cst_28 : f32 to vector<24x4xf32>
    %61 = arith.maximumf %59, %60 : vector<24x4xf32>
    %62 = vector.extract_strided_slice %30 {offsets = [4, 0], sizes = [4, 32], strides = [1, 1]} : vector<32x32xf32> to vector<4x32xf32>
    %cst_29 = arith.constant dense<0.000000e+00> : vector<24x32xf32>
    %63 = tpu.matmul %61, %62, %cst_29 {dimension_numbers = #tpu.dot_dimension_numbers<[1], [0], [0], [1], [0, 0, 1, 1], [], []>} : vector<24x4xf32>, vector<4x32xf32>, vector<24x32xf32> -> vector<24x32xf32>
    %64 = arith.addf %48, %63 : vector<24x32xf32>
    %65 = vector.extract_strided_slice %3 {offsets = [0, 8], sizes = [24, 4], strides = [1, 1]} : vector<24x32xf32> to vector<24x4xf32>
    %66 = vector.extract_strided_slice %4 {offsets = [0, 8], sizes = [24, 4], strides = [1, 1]} : vector<24x32xf32> to vector<24x4xf32>
    %67 = vector.extract_strided_slice %5 {offsets = [0, 8], sizes = [24, 4], strides = [1, 1]} : vector<24x32xf32> to vector<24x4xf32>
    %cst_30 = arith.constant dense<0.000000e+00> : vector<24x24xf32>
    %68 = tpu.matmul %65, %66, %cst_30 {dimension_numbers = #tpu.dot_dimension_numbers<[1], [1], [0], [0], [0, 0, 1, 0], [], []>} : vector<24x4xf32>, vector<24x4xf32>, vector<24x24xf32> -> vector<24x24xf32>
    %cst_31 = arith.constant 5.000000e-01 : f32
    %69 = vector.broadcast %cst_31 : f32 to vector<24x24xf32>
    %70 = arith.mulf %69, %18 : vector<24x24xf32>
    %71 = arith.addf %68, %70 : vector<24x24xf32>
    %cst_32 = arith.constant 0.984250962 : f32
    %72 = vector.broadcast %cst_32 : f32 to vector<24x24xf32>
    %73 = arith.mulf %71, %72 : vector<24x24xf32>
    %74 = arith.addf %58, %73 : vector<24x24xf32>
    %cst_33 = arith.constant dense<0.000000e+00> : vector<24x4xf32>
    %75 = tpu.matmul %73, %67, %cst_33 {dimension_numbers = #tpu.dot_dimension_numbers<[1], [0], [0], [1], [0, 0, 1, 1], [], []>} : vector<24x24xf32>, vector<24x4xf32>, vector<24x4xf32> -> vector<24x4xf32>
    %cst_34 = arith.constant 0.000000e+00 : f32
    %76 = vector.broadcast %cst_34 : f32 to vector<24x4xf32>
    %77 = arith.maximumf %75, %76 : vector<24x4xf32>
    %78 = vector.extract_strided_slice %30 {offsets = [8, 0], sizes = [4, 32], strides = [1, 1]} : vector<32x32xf32> to vector<4x32xf32>
    %cst_35 = arith.constant dense<0.000000e+00> : vector<24x32xf32>
    %79 = tpu.matmul %77, %78, %cst_35 {dimension_numbers = #tpu.dot_dimension_numbers<[1], [0], [0], [1], [0, 0, 1, 1], [], []>} : vector<24x4xf32>, vector<4x32xf32>, vector<24x32xf32> -> vector<24x32xf32>
    %80 = arith.addf %64, %79 : vector<24x32xf32>
    %81 = vector.extract_strided_slice %3 {offsets = [0, 12], sizes = [24, 4], strides = [1, 1]} : vector<24x32xf32> to vector<24x4xf32>
    %82 = vector.extract_strided_slice %4 {offsets = [0, 12], sizes = [24, 4], strides = [1, 1]} : vector<24x32xf32> to vector<24x4xf32>
    %83 = vector.extract_strided_slice %5 {offsets = [0, 12], sizes = [24, 4], strides = [1, 1]} : vector<24x32xf32> to vector<24x4xf32>
    %cst_36 = arith.constant dense<0.000000e+00> : vector<24x24xf32>
    %84 = tpu.matmul %81, %82, %cst_36 {dimension_numbers = #tpu.dot_dimension_numbers<[1], [1], [0], [0], [0, 0, 1, 0], [], []>} : vector<24x4xf32>, vector<24x4xf32>, vector<24x24xf32> -> vector<24x24xf32>
    %cst_37 = arith.constant 5.000000e-01 : f32
    %85 = vector.broadcast %cst_37 : f32 to vector<24x24xf32>
    %86 = arith.mulf %85, %18 : vector<24x24xf32>
    %87 = arith.addf %84, %86 : vector<24x24xf32>
    %cst_38 = arith.constant 0.984250962 : f32
    %88 = vector.broadcast %cst_38 : f32 to vector<24x24xf32>
    %89 = arith.mulf %87, %88 : vector<24x24xf32>
    %90 = arith.addf %74, %89 : vector<24x24xf32>
    %cst_39 = arith.constant dense<0.000000e+00> : vector<24x4xf32>
    %91 = tpu.matmul %89, %83, %cst_39 {dimension_numbers = #tpu.dot_dimension_numbers<[1], [0], [0], [1], [0, 0, 1, 1], [], []>} : vector<24x24xf32>, vector<24x4xf32>, vector<24x4xf32> -> vector<24x4xf32>
    %cst_40 = arith.constant 0.000000e+00 : f32
    %92 = vector.broadcast %cst_40 : f32 to vector<24x4xf32>
    %93 = arith.maximumf %91, %92 : vector<24x4xf32>
    %94 = vector.extract_strided_slice %30 {offsets = [12, 0], sizes = [4, 32], strides = [1, 1]} : vector<32x32xf32> to vector<4x32xf32>
    %cst_41 = arith.constant dense<0.000000e+00> : vector<24x32xf32>
    %95 = tpu.matmul %93, %94, %cst_41 {dimension_numbers = #tpu.dot_dimension_numbers<[1], [0], [0], [1], [0, 0, 1, 1], [], []>} : vector<24x4xf32>, vector<4x32xf32>, vector<24x32xf32> -> vector<24x32xf32>
    %96 = arith.addf %80, %95 : vector<24x32xf32>
    %97 = vector.extract_strided_slice %3 {offsets = [0, 16], sizes = [24, 4], strides = [1, 1]} : vector<24x32xf32> to vector<24x4xf32>
    %98 = vector.extract_strided_slice %4 {offsets = [0, 16], sizes = [24, 4], strides = [1, 1]} : vector<24x32xf32> to vector<24x4xf32>
    %99 = vector.extract_strided_slice %5 {offsets = [0, 16], sizes = [24, 4], strides = [1, 1]} : vector<24x32xf32> to vector<24x4xf32>
    %cst_42 = arith.constant dense<0.000000e+00> : vector<24x24xf32>
    %100 = tpu.matmul %97, %98, %cst_42 {dimension_numbers = #tpu.dot_dimension_numbers<[1], [1], [0], [0], [0, 0, 1, 0], [], []>} : vector<24x4xf32>, vector<24x4xf32>, vector<24x24xf32> -> vector<24x24xf32>
    %cst_43 = arith.constant 5.000000e-01 : f32
    %101 = vector.broadcast %cst_43 : f32 to vector<24x24xf32>
    %102 = arith.mulf %101, %29 : vector<24x24xf32>
    %103 = arith.addf %100, %102 : vector<24x24xf32>
    %cst_44 = arith.constant 0.984250962 : f32
    %104 = vector.broadcast %cst_44 : f32 to vector<24x24xf32>
    %105 = arith.mulf %103, %104 : vector<24x24xf32>
    %106 = arith.addf %90, %105 : vector<24x24xf32>
    %cst_45 = arith.constant dense<0.000000e+00> : vector<24x4xf32>
    %107 = tpu.matmul %105, %99, %cst_45 {dimension_numbers = #tpu.dot_dimension_numbers<[1], [0], [0], [1], [0, 0, 1, 1], [], []>} : vector<24x24xf32>, vector<24x4xf32>, vector<24x4xf32> -> vector<24x4xf32>
    %cst_46 = arith.constant 0.000000e+00 : f32
    %108 = vector.broadcast %cst_46 : f32 to vector<24x4xf32>
    %109 = arith.maximumf %107, %108 : vector<24x4xf32>
    %110 = vector.extract_strided_slice %30 {offsets = [16, 0], sizes = [4, 32], strides = [1, 1]} : vector<32x32xf32> to vector<4x32xf32>
    %cst_47 = arith.constant dense<0.000000e+00> : vector<24x32xf32>
    %111 = tpu.matmul %109, %110, %cst_47 {dimension_numbers = #tpu.dot_dimension_numbers<[1], [0], [0], [1], [0, 0, 1, 1], [], []>} : vector<24x4xf32>, vector<4x32xf32>, vector<24x32xf32> -> vector<24x32xf32>
    %112 = arith.addf %96, %111 : vector<24x32xf32>
    %113 = vector.extract_strided_slice %3 {offsets = [0, 20], sizes = [24, 4], strides = [1, 1]} : vector<24x32xf32> to vector<24x4xf32>
    %114 = vector.extract_strided_slice %4 {offsets = [0, 20], sizes = [24, 4], strides = [1, 1]} : vector<24x32xf32> to vector<24x4xf32>
    %115 = vector.extract_strided_slice %5 {offsets = [0, 20], sizes = [24, 4], strides = [1, 1]} : vector<24x32xf32> to vector<24x4xf32>
    %cst_48 = arith.constant dense<0.000000e+00> : vector<24x24xf32>
    %116 = tpu.matmul %113, %114, %cst_48 {dimension_numbers = #tpu.dot_dimension_numbers<[1], [1], [0], [0], [0, 0, 1, 0], [], []>} : vector<24x4xf32>, vector<24x4xf32>, vector<24x24xf32> -> vector<24x24xf32>
    %cst_49 = arith.constant 5.000000e-01 : f32
    %117 = vector.broadcast %cst_49 : f32 to vector<24x24xf32>
    %118 = arith.mulf %117, %29 : vector<24x24xf32>
    %119 = arith.addf %116, %118 : vector<24x24xf32>
    %cst_50 = arith.constant 0.984250962 : f32
    %120 = vector.broadcast %cst_50 : f32 to vector<24x24xf32>
    %121 = arith.mulf %119, %120 : vector<24x24xf32>
    %122 = arith.addf %106, %121 : vector<24x24xf32>
    %cst_51 = arith.constant dense<0.000000e+00> : vector<24x4xf32>
    %123 = tpu.matmul %121, %115, %cst_51 {dimension_numbers = #tpu.dot_dimension_numbers<[1], [0], [0], [1], [0, 0, 1, 1], [], []>} : vector<24x24xf32>, vector<24x4xf32>, vector<24x4xf32> -> vector<24x4xf32>
    %cst_52 = arith.constant 0.000000e+00 : f32
    %124 = vector.broadcast %cst_52 : f32 to vector<24x4xf32>
    %125 = arith.maximumf %123, %124 : vector<24x4xf32>
    %126 = vector.extract_strided_slice %30 {offsets = [20, 0], sizes = [4, 32], strides = [1, 1]} : vector<32x32xf32> to vector<4x32xf32>
    %cst_53 = arith.constant dense<0.000000e+00> : vector<24x32xf32>
    %127 = tpu.matmul %125, %126, %cst_53 {dimension_numbers = #tpu.dot_dimension_numbers<[1], [0], [0], [1], [0, 0, 1, 1], [], []>} : vector<24x4xf32>, vector<4x32xf32>, vector<24x32xf32> -> vector<24x32xf32>
    %128 = arith.addf %112, %127 : vector<24x32xf32>
    %129 = vector.extract_strided_slice %3 {offsets = [0, 24], sizes = [24, 4], strides = [1, 1]} : vector<24x32xf32> to vector<24x4xf32>
    %130 = vector.extract_strided_slice %4 {offsets = [0, 24], sizes = [24, 4], strides = [1, 1]} : vector<24x32xf32> to vector<24x4xf32>
    %131 = vector.extract_strided_slice %5 {offsets = [0, 24], sizes = [24, 4], strides = [1, 1]} : vector<24x32xf32> to vector<24x4xf32>
    %cst_54 = arith.constant dense<0.000000e+00> : vector<24x24xf32>
    %132 = tpu.matmul %129, %130, %cst_54 {dimension_numbers = #tpu.dot_dimension_numbers<[1], [1], [0], [0], [0, 0, 1, 0], [], []>} : vector<24x4xf32>, vector<24x4xf32>, vector<24x24xf32> -> vector<24x24xf32>
    %cst_55 = arith.constant 0.984250962 : f32
    %133 = vector.broadcast %cst_55 : f32 to vector<24x24xf32>
    %134 = arith.mulf %132, %133 : vector<24x24xf32>
    %135 = arith.addf %122, %134 : vector<24x24xf32>
    %cst_56 = arith.constant dense<0.000000e+00> : vector<24x4xf32>
    %136 = tpu.matmul %134, %131, %cst_56 {dimension_numbers = #tpu.dot_dimension_numbers<[1], [0], [0], [1], [0, 0, 1, 1], [], []>} : vector<24x24xf32>, vector<24x4xf32>, vector<24x4xf32> -> vector<24x4xf32>
    %cst_57 = arith.constant 0.000000e+00 : f32
    %137 = vector.broadcast %cst_57 : f32 to vector<24x4xf32>
    %138 = arith.maximumf %136, %137 : vector<24x4xf32>
    %139 = vector.extract_strided_slice %30 {offsets = [24, 0], sizes = [4, 32], strides = [1, 1]} : vector<32x32xf32> to vector<4x32xf32>
    %cst_58 = arith.constant dense<0.000000e+00> : vector<24x32xf32>
    %140 = tpu.matmul %138, %139, %cst_58 {dimension_numbers = #tpu.dot_dimension_numbers<[1], [0], [0], [1], [0, 0, 1, 1], [], []>} : vector<24x4xf32>, vector<4x32xf32>, vector<24x32xf32> -> vector<24x32xf32>
    %141 = arith.addf %128, %140 : vector<24x32xf32>
    %142 = vector.extract_strided_slice %3 {offsets = [0, 28], sizes = [24, 4], strides = [1, 1]} : vector<24x32xf32> to vector<24x4xf32>
    %143 = vector.extract_strided_slice %4 {offsets = [0, 28], sizes = [24, 4], strides = [1, 1]} : vector<24x32xf32> to vector<24x4xf32>
    %144 = vector.extract_strided_slice %5 {offsets = [0, 28], sizes = [24, 4], strides = [1, 1]} : vector<24x32xf32> to vector<24x4xf32>
    %cst_59 = arith.constant dense<0.000000e+00> : vector<24x24xf32>
    %145 = tpu.matmul %142, %143, %cst_59 {dimension_numbers = #tpu.dot_dimension_numbers<[1], [1], [0], [0], [0, 0, 1, 0], [], []>} : vector<24x4xf32>, vector<24x4xf32>, vector<24x24xf32> -> vector<24x24xf32>
    %cst_60 = arith.constant 0.984250962 : f32
    %146 = vector.broadcast %cst_60 : f32 to vector<24x24xf32>
    %147 = arith.mulf %145, %146 : vector<24x24xf32>
    %148 = arith.addf %135, %147 : vector<24x24xf32>
    %cst_61 = arith.constant dense<0.000000e+00> : vector<24x4xf32>
    %149 = tpu.matmul %147, %144, %cst_61 {dimension_numbers = #tpu.dot_dimension_numbers<[1], [0], [0], [1], [0, 0, 1, 1], [], []>} : vector<24x24xf32>, vector<24x4xf32>, vector<24x4xf32> -> vector<24x4xf32>
    %cst_62 = arith.constant 0.000000e+00 : f32
    %150 = vector.broadcast %cst_62 : f32 to vector<24x4xf32>
    %151 = arith.maximumf %149, %150 : vector<24x4xf32>
    %152 = vector.extract_strided_slice %30 {offsets = [28, 0], sizes = [4, 32], strides = [1, 1]} : vector<32x32xf32> to vector<4x32xf32>
    %cst_63 = arith.constant dense<0.000000e+00> : vector<24x32xf32>
    %153 = tpu.matmul %151, %152, %cst_63 {dimension_numbers = #tpu.dot_dimension_numbers<[1], [0], [0], [1], [0, 0, 1, 1], [], []>} : vector<24x4xf32>, vector<4x32xf32>, vector<24x32xf32> -> vector<24x32xf32>
    %154 = arith.addf %141, %153 : vector<24x32xf32>
    %155 = arith.addf %0, %154 : vector<24x32xf32>
    %c0_64 = arith.constant 0 : index
    %c0_65 = arith.constant 0 : index
    %156 = vector.load %arg3[%c0_64, %c0_65] : memref<1x32xf32, #tpu.memory_space<vmem>>, vector<1x32xf32>
    %157 = vector.broadcast %156 : vector<1x32xf32> to vector<24x32xf32>
    %158 = arith.addf %155, %157 : vector<24x32xf32>
    %cst_66 = arith.constant dense<0.000000e+00> : vector<24xf32>
    %159 = vector.multi_reduction <add>, %158, %cst_66 [1] : vector<24x32xf32> to vector<24xf32>
    %160 = vector.shape_cast %159 : vector<24xf32> to vector<24x1xf32>
    %cst_67 = arith.constant 3.200000e+01 : f32
    %161 = vector.broadcast %cst_67 : f32 to vector<24x1xf32>
    %162 = arith.divf %160, %161 : vector<24x1xf32>
    %163 = vector.broadcast %162 : vector<24x1xf32> to vector<24x32xf32>
    %164 = arith.subf %158, %163 : vector<24x32xf32>
    %165 = arith.mulf %164, %164 : vector<24x32xf32>
    %cst_68 = arith.constant dense<0.000000e+00> : vector<24xf32>
    %166 = vector.multi_reduction <add>, %165, %cst_68 [1] : vector<24x32xf32> to vector<24xf32>
    %167 = vector.shape_cast %166 : vector<24xf32> to vector<24x1xf32>
    %cst_69 = arith.constant 3.200000e+01 : f32
    %168 = vector.broadcast %cst_69 : f32 to vector<24x1xf32>
    %169 = arith.divf %167, %168 : vector<24x1xf32>
    %170 = vector.broadcast %162 : vector<24x1xf32> to vector<24x32xf32>
    %171 = arith.subf %158, %170 : vector<24x32xf32>
    %cst_70 = arith.constant 9.99999974E-6 : f32
    %172 = vector.broadcast %cst_70 : f32 to vector<24x1xf32>
    %173 = arith.addf %169, %172 : vector<24x1xf32>
    %174 = math.rsqrt %173 : vector<24x1xf32>
    %175 = vector.broadcast %174 : vector<24x1xf32> to vector<24x32xf32>
    %176 = arith.mulf %171, %175 : vector<24x32xf32>
    %c0_71 = arith.constant 0 : index
    %c0_72 = arith.constant 0 : index
    %177 = vector.load %arg4[%c0_71, %c0_72] : memref<1x32xf32, #tpu.memory_space<vmem>>, vector<1x32xf32>
    %178 = vector.broadcast %177 : vector<1x32xf32> to vector<24x32xf32>
    %179 = arith.mulf %176, %178 : vector<24x32xf32>
    %c0_73 = arith.constant 0 : index
    %c0_74 = arith.constant 0 : index
    %180 = vector.load %arg5[%c0_73, %c0_74] : memref<1x32xf32, #tpu.memory_space<vmem>>, vector<1x32xf32>
    %181 = vector.broadcast %180 : vector<1x32xf32> to vector<24x32xf32>
    %182 = arith.addf %179, %181 : vector<24x32xf32>
    %c0_75 = arith.constant 0 : index
    %c0_76 = arith.constant 0 : index
    %183 = vector.load %arg7[%c0_75, %c0_76] : memref<24x32xf32, #tpu.memory_space<vmem>>, vector<24x32xf32>
    tpu.vector_store %arg7[%c0_75, %c0_76], %182 {strides = array<i32>} : memref<24x32xf32, #tpu.memory_space<vmem>>, vector<24x32xf32>,
    %cst_77 = arith.constant 1.250000e-01 : f32
    %184 = vector.broadcast %cst_77 : f32 to vector<24x24xf32>
    %185 = arith.mulf %148, %184 : vector<24x24xf32>
    %c0_78 = arith.constant 0 : index
    %c0_79 = arith.constant 0 : index
    %186 = vector.load %arg8[%c0_78, %c0_79] : memref<24x24xf32, #tpu.memory_space<vmem>>, vector<24x24xf32>
    tpu.vector_store %arg8[%c0_78, %c0_79], %185 {strides = array<i32>} : memref<24x24xf32, #tpu.memory_space<vmem>>, vector<24x24xf32>,
    return
  }
}

</mosaic_0001>

<bundles_post_ra>
// kernel: tpu_custom_call.1
= control target key start
LH: loop header
LB: loop body
LE: loop exit
PB: predicated region body
PF: predicated region fallthrough
CT: control target
= control target key end

     0   :  { %14 = vsyncpa [#allocation3], 0  ;;  %s4597_s0 = inlined_call_operand.hbm [shape: f32[24,32], index: 0, kind: input, shape index: {}]   ;;  %s4598_s1 = inlined_call_operand.hbm [shape: f32[32,96], index: 1, kind: input, shape index: {}]   ;;  %s4599_s2 = inlined_call_operand.hbm [shape: f32[32,32], index: 2, kind: input, shape index: {}]   ;;  %s4600_s3 = inlined_call_operand.vmem [shape: f32[1,32], index: 3, kind: input, shape index: {}]   ;;  %s4601_s4 = inlined_call_operand.vmem [shape: f32[1,32], index: 4, kind: input, shape index: {}]   ;;  %s4602_s5 = inlined_call_operand.vmem [shape: f32[1,32], index: 5, kind: input, shape index: {}]   ;;  %s4603_s6 = inlined_call_operand.hbm [shape: f32[3,24,24], index: 6, kind: input, shape index: {}]   ;;  %s4604_s7 = inlined_call_operand.hbm [shape: f32[24,32], index: 7, kind: output, shape index: {0}]   ;;  %s4605_s8 = inlined_call_operand.hbm [shape: f32[24,24], index: 8, kind: output, shape index: {1}]  }
   0x1   :  { %15 = vsyncpa [#allocation6], 0 }
   0x2   :  { %16 = vsyncpa [#allocation9], 0 }
   0x3   :  { %17 = vsyncpa [#allocation4], 0 }
   0x4   :  { %18 = vsyncpa [#allocation12], 0  ;;  %s3776_s27 = smov [#allocation5]   ;;  %s3777_s29 = smov [#allocation2]  }
   0x5   :  { %s36_s28 = sshll.u32 %s3776_s27, 4  ;;  %s24_s30 = sshll.u32 %s3777_s29, 4  ;;  %s37_s28 = int_to_ptr.vmem [resolvable:$true] %s36_s28  ;;  %s3855_s30 = int_to_ptr.vmem [resolvable:$true] %s24_s30 }
   0x6   :  { %s3634_s11 = scalar_lea.hbm %s4598_s1, 512 }
   0x7   :  { %p3635_p0 = scmp.ne.s32.totalorder %s4598_s1, %s3634_s11  ;;  %p3638_p1 = scmp.lt.u32.totalorder %s3634_s11, %s4598_s1 }
   0x9   :  { %p3640_p2 = pnand %p3638_p1, %p3635_p0 }
   0xb   :  { %3643 = shalt.err (!%p3640_p2)
}
   0xc   :  { %s3644_s16 = scalar_lea.vmem %s37_s28, 512  ;;  %p3649_p4 = scmp.lt.s32.totalorder %s37_s28, %s37_s28 }
   0xd   :  { %p3645_p3 = scmp.ne.s32.totalorder %s37_s28, %s3644_s16  ;;  %p3650_p5 = scmp.lt.s32.totalorder %s3644_s16, %s3644_s16 }
   0xf   :  { %p3651_p6 = por %p3650_p5, %p3649_p4 }
  0x11   :  { %p3652_p7 = pnand %p3651_p6, %p3645_p3 }
  0x13   :  { %3655 = shalt.err (!%p3652_p7)
}
  0x14   :  { %s3778_s17 = smov 128   ;;  %s3779_s18 = smov 8  }
  0x15   :  { %42 = dma.hbm_to_vmem [thread:$0]  %s4598_s1, 512, %s37_s28, [#allocation6], %s3778_s17, %s3778_s17, %s3779_s18  }
  0x16   :  { %s3656_s23 = scalar_lea.hbm %s4597_s0, 384 }
  0x17   :  { %p3657_p8 = scmp.ne.s32.totalorder %s4597_s0, %s3656_s23  ;;  %p3660_p9 = scmp.lt.u32.totalorder %s3656_s23, %s4597_s0 }
  0x19   :  { %p3662_p10 = pnand %p3660_p9, %p3657_p8 }
  0x1b   :  { %3665 = shalt.err (!%p3662_p10)
}
  0x1c   :  { %s3666_s29 = scalar_lea.vmem %s3855_s30, 384  ;;  %p3671_p12 = scmp.lt.s32.totalorder %s3855_s30, %s3855_s30 }
  0x1d   :  { %p3667_p11 = scmp.ne.s32.totalorder %s3855_s30, %s3666_s29  ;;  %p3672_p13 = scmp.lt.s32.totalorder %s3666_s29, %s3666_s29 }
  0x1f   :  { %p3673_p0 = por %p3672_p13, %p3671_p12 }
  0x21   :  { %p3674_p1 = pnand %p3673_p0, %p3667_p11 }
  0x23   :  { %3677 = shalt.err (!%p3674_p1)
}
  0x24   :  { %30 = dma.hbm_to_vmem [thread:$0]  %s4597_s0, 384, %s3855_s30, [#allocation3], %s3778_s17, %s3778_s17, %s3779_s18  }
  0x25   :  { %s3780_s9 = smov [#allocation7]   ;;  %s3781_s11 = smov [#allocation8]  }
  0x26   :  { %s48_s10 = sshll.u32 %s3780_s9, 4  ;;  %s66_s12 = sshll.u32 %s3781_s11, 4  ;;  %s49_s10 = int_to_ptr.vmem [resolvable:$true] %s48_s10  ;;  %s3892_s12 = int_to_ptr.vmem [resolvable:$true] %s66_s12 }
  0x27   :  { %s3678_s15 = scalar_lea.hbm %s4599_s2, 512 }
  0x28   :  { %p3679_p2 = scmp.ne.s32.totalorder %s4599_s2, %s3678_s15  ;;  %p3682_p3 = scmp.lt.u32.totalorder %s3678_s15, %s4599_s2 }
  0x2a   :  { %p3684_p4 = pnand %p3682_p3, %p3679_p2 }
  0x2c   :  { %3687 = shalt.err (!%p3684_p4)
}
  0x2d   :  { %s3688_s0 = scalar_lea.vmem %s49_s10, 512  ;;  %p3693_p6 = scmp.lt.s32.totalorder %s49_s10, %s49_s10 }
  0x2e   :  { %p3689_p5 = scmp.ne.s32.totalorder %s49_s10, %s3688_s0  ;;  %p3694_p7 = scmp.lt.s32.totalorder %s3688_s0, %s3688_s0 }
  0x30   :  { %p3695_p8 = por %p3694_p7, %p3693_p6 }
  0x32   :  { %p3696_p9 = pnand %p3695_p8, %p3689_p5 }
  0x34   :  { %3699 = shalt.err (!%p3696_p9)
}
  0x35   :  { %54 = dma.hbm_to_vmem [thread:$0]  %s4599_s2, 512, %s49_s10, [#allocation6], %s3778_s17, %s3778_s17, %s3779_s18  }
  0x36   :  { %s3700_s25 = scalar_lea.hbm %s4603_s6, 1152 }
  0x37   :  { %p3701_p10 = scmp.ne.s32.totalorder %s4603_s6, %s3700_s25  ;;  %p3704_p11 = scmp.lt.u32.totalorder %s3700_s25, %s4603_s6 }
  0x39   :  { %p3706_p12 = pnand %p3704_p11, %p3701_p10 }
  0x3b   :  { %3709 = shalt.err (!%p3706_p12)
}
  0x3c   :  { %s3710_s28 = scalar_lea.vmem %s3892_s12, 1152  ;;  %p3715_p0 = scmp.lt.s32.totalorder %s3892_s12, %s3892_s12 }
  0x3d   :  { %p3711_p13 = scmp.ne.s32.totalorder %s3892_s12, %s3710_s28  ;;  %p3716_p1 = scmp.lt.s32.totalorder %s3710_s28, %s3710_s28 }
  0x3f   :  { %p3717_p2 = por %p3716_p1, %p3715_p0 }
  0x41   :  { %p3718_p3 = pnand %p3717_p2, %p3711_p13 }
  0x43   :  { %3721 = shalt.err (!%p3718_p3)
}
  0x44   :  { %72 = dma.hbm_to_vmem [thread:$0]  %s4603_s6, 1152, %s3892_s12, [#allocation9], %s3778_s17, %s3778_s17, %s3779_s18  }
  0x45   :  { %3766 = dma.done.wait [#allocation3], 384  }
  0x46   :  { %3767 = vsyncadd [#allocation3], 4294966912 }
  0x47   :  { %3768 = dma.done.wait [#allocation6], 1024  }
  0x48   :  { %3769 = vsyncadd [#allocation6], 4294966272 }
  0x49   :  { %3770 = dma.done.wait [#allocation9], 1152  }
  0x4a   :  { %3771 = vsyncadd [#allocation9], 4294966144  ;;  %v3782_v0 = vmov 0.0|0.0   ;;  %vm3783_vm0 = vmmov 0   ;;  %v3784_v1 = vmov 0.0   ;;  %v88_v2 = vld [vmem:[#allocation5] sm:$0xff] }
  0x4b   :  { %3421 = vmatprep.subr.bf16.mxu0 %v3782_v0  ;;  %3084 = vmatprep.mubr.msk.f32.mxu0 %vm3783_vm0, %v3784_v1  ;;  %v89_v3 = vld [vmem:[#allocation5 + $0x8] sm:$0xff]  ;;  %v90_v4 = vld [vmem:[#allocation5 + $0x10] sm:$0xff]  ;;  %v91_v6 = vld [vmem:[#allocation5 + $0x18] sm:$0xff]  ;;  %vm92_vm1 = vcmask 261120   ;;  %s3785_s6 = smov 92   ;;  %s3786_s10 = smov 96  }
  0x4c   :  { %3427 = vmatprep.subr.bf16.mxu1 %v3782_v0  ;;  %3099 = vmatprep.mubr.msk.f32.mxu1 %vm3783_vm0, %v3784_v1  ;;  %v3422_v5 = vpack.c.bf16 %v89_v3, %v88_v2  ;;  %v3425_v7 = vpack.c.bf16 %v91_v6, %v90_v4  ;;  %v85_v8 = vld [vmem:[#allocation2] sm:$0xff]  ;;  %v86_v9 = vld [vmem:[#allocation2 + $0x8] sm:$0xff]  ;;  %v87_v10 = vld [vmem:[#allocation2 + $0x10] sm:$0xff]  ;;  %s3787_s11 = smov 124   ;;  %s3788_s12 = smov 64   ;;  %vm189_vm2 = vcmask 195584  }
  0x4d   :  { %s3789_s13 = smov 60   ;;  %s3790_s14 = smov 88   ;;  %v3972_v18 = vld [vmem:[#allocation8 + $0x18] sm:$0xff]  ;;  %v3976_v20 = vld [vmem:[#allocation8 + $0x28] sm:$0xff]  ;;  %v3978_v21 = vld [vmem:[#allocation8 + $0x20] sm:$0xff]  ;;  %vm276_vm3 = vcmask 31744  }
  0x4e   :  { %3423 = vmatpush3.bf16.msra.mxu0 %v3422_v5  ;;  %s3791_s15 = smov 120   ;;  %v190_v19 = vsel %vm189_vm2, %v3972_v18, -inf  ;;  %v196_v22 = vsel %vm189_vm2, %v3976_v20, -inf  ;;  %v193_v23 = vsel %vm189_vm2, %v3978_v21, -inf  ;;  %vm3986_vm4 = vmpackc.low %vm276_vm3, %vm276_vm3  ;;  %s3792_s16 = smov 56   ;;  %v4070_v6 = vld [vmem:[#allocation8 + $0x30] sm:$0xff] }
  0x4f   :  { %3424 = vmatprep.subr.bf16.mxu0 %v3782_v0  ;;  %s3793_s19 = smov 84   ;;  %s3794_s20 = smov 116   ;;  %vm698_vm5 = vcmask 1043456  }
  0x50   :  { %s3795_s21 = smov 52   ;;  %s3796_s0 = smov 80  }
  0x51   :  { %s3797_s30 = smov 112   ;;  %s3798_s22 = smov 48  }
  0x52   :  { %3426 = vmatpush3.bf16.msra.mxu0 %v3425_v7  ;;  %v227_v7 = vsel %vm189_vm2, %v4070_v6, -inf  ;;  %s3799_s23 = smov 76   ;;  %s3800_s24 = smov 108  }
  0x53   :  { %3431 = vmatprep.subr.bf16.mxu0 %v3782_v0  ;;  %s3801_s25 = smov 44   ;;  %s3802_s26 = smov 72  }
  0x54   :  { %s3803_s27 = smov 104   ;;  %s3804_s29 = smov 40  }
  0x55   :  { %3085 = vmatmul.mubr.msk.f32.vlgmr.msra.gmra.mrb[0].mxu0 %vm92_vm1, %v85_v8  ;;  %v4074_v8 = vld [vmem:[#allocation8 + $0x40] sm:$0xff]  ;;  %s3805_s1 = smov 68   ;;  %s3806_s28 = smov 100  }
  0x56   :  { %3087 = vmatprep.mubr.msk.f32.mxu0 %vm3783_vm0, %v3784_v1  ;;  %s3807_s2 = smov 36  }
  0x59   :  { %3088 = vmatmul.mubr.msk.f32.gmra.mrb[2].mxu0 %vm92_vm1, %v86_v9  ;;  %v233_v9 = vsel %vm189_vm2, %v4074_v8, -inf }
  0x5a   :  { %3090 = vmatprep.mubr.msk.f32.mxu0 %vm3783_vm0, %v3784_v1 }
  0x5d   :  { %3091 = vmatmul.mubr.msk.f32.gmra.mrb[4].mxu0 %vm92_vm1, %v87_v10  ;;  %v4078_v10 = vld [vmem:[#allocation8 + $0x38] sm:$0xff] }
  0x5e   :  { %3114 = vmatprep.mubr.msk.f32.mxu0 %vm3783_vm0, %v3784_v1 }
 0x128   :  { %v3946_v11 = vpop.f32.mrb[0].mxu0 }
 0x129   :  { %v3086_v12 = vpop.f32.mrb[1].mxu0 }
 0x12a   :  { %v230_v12 = vsel %vm189_vm2, %v4078_v10, -inf }
 0x12c   :  { %v3948_v13 = vpop.f32.mrb[2].mxu0 }
 0x12d   :  { %v3089_v14 = vpop.f32.mrb[3].mxu0  ;;  %v3952_v15 = vpack.i.bf16 %v3948_v13, %v3946_v11 }
 0x12e   :  { %v182_v14 = vld [vmem:[#allocation8] sm:$0xff] }
 0x12f   :  { %3527 = vrot.lane.b32.xlu1 %v3952_v15, %s3785_s6  ;;  %3522 = vrot.lane.b32.xlu0 %v3952_v15, %s3786_s10 }
 0x130   :  { %v3956_v16 = vpop.f32.mrb[4].mxu0 }
 0x131   :  { %v3092_v17 = vpop.f32.mrb[5].mxu0 }
 0x132   :  { %v264_v17 = vmul.f32 0.5, %v182_v14 }
 0x133   :  { %486 = vrot.lane.b32.xlu1 %v3956_v16, %s3785_s6  ;;  %274 = vrot.lane.b32.xlu0 %v3956_v16, %s3786_s10 }
 0x137   :  { %478 = vrot.lane.b32.xlu1 %v3948_v13, %s3787_s11  ;;  %476 = vrot.lane.b32.xlu0 %v3946_v11, %s3787_s11 }
 0x13b   :  { %3532 = vrot.lane.b32.xlu1 %v3952_v15, %s3788_s12  ;;  %480 = vrot.lane.b32.xlu0 %v3956_v16, %s3787_s11 }
 0x13f   :  { %3537 = vrot.lane.b32.xlu1 %v3952_v15, %s3789_s13  ;;  %379 = vrot.lane.b32.xlu0 %v3956_v16, %s3788_s12 }
 0x143   :  { %3542 = vrot.lane.b32.xlu1 %v3952_v15, %s3790_s14  ;;  %590 = vrot.lane.b32.xlu0 %v3956_v16, %s3789_s13 }
 0x147   :  { %875 = vrot.lane.b32.xlu1 %v3946_v11, %s3791_s15  ;;  %885 = vrot.lane.b32.xlu0 %v3956_v16, %s3790_s14 }
 0x14b   :  { %879 = vrot.lane.b32.xlu1 %v3956_v16, %s3791_s15  ;;  %877 = vrot.lane.b32.xlu0 %v3948_v13, %s3791_s15 }
 0x16a   :  { %191 = vmax.xlane.f32.xlu0 %v190_v19 }
 0x16e   :  { %197 = vmax.xlane.f32.xlu0 %v196_v22 }
 0x16f   :  { %194 = vmax.xlane.f32.xlu1 %v193_v23  ;;  %v184_v23 = vld [vmem:[#allocation8 + $0x10] sm:$0xff] }
 0x1a1   :  { %v3528_v24 = vpop.permute.xlu1 %3527  ;;  %v3523_v25 = vpop.permute.xlu0 %3522 }
 0x1a2   :  { %v3525_v26 = vunpack.i.h.bf16 %v3523_v25  ;;  %v3524_v27 = vunpack.i.l.bf16 %v3523_v25  ;;  %v3530_v34 = vunpack.i.h.bf16 %v3528_v24  ;;  %v3529_v35 = vunpack.i.l.bf16 %v3528_v24 }
 0x1a4   :  { %v3428_v29 = vpack.c.bf16 %v3525_v26, %v3524_v27  ;;  %v3435_v40 = vpack.c.bf16 %v3530_v34, %v3529_v35 }
 0x1a5   :  { %v487_v30 = vpop.permute.xlu1 %486  ;;  %v275_v31 = vpop.permute.xlu0 %274 }
 0x1a6   :  { %3430 = vmatpush3.bf16.xpose.msk.msra.mxu1 %vm3986_vm4, %v3428_v29  ;;  %v266_v29 = vmul.f32 0.5, %v184_v23 }
 0x1a7   :  { %3097 = vmatprep.subr.mxu1 %v3784_v1 }
 0x1a9   :  { %v479_v32 = vpop.permute.xlu1 %478  ;;  %v477_v33 = vpop.permute.xlu0 %476 }
 0x1ad   :  { %v3533_v36 = vpop.permute.xlu1 %3532  ;;  %v481_v39 = vpop.permute.xlu0 %480 }
 0x1ae   :  { %v3535_v37 = vunpack.i.h.bf16 %v3533_v36  ;;  %v3534_v38 = vunpack.i.l.bf16 %v3533_v36  ;;  %3098 = vmatpush3.xpose.msk.msra.mxu1 %vm276_vm3, %v275_v31 }
 0x1af   :  { %3434 = vmatprep.subr.bf16.mxu1 %v3782_v0 }
 0x1b0   :  { %v3432_v41 = vpack.c.bf16 %v3535_v37, %v3534_v38 }
 0x1b1   :  { %3100 = vmatmul.mubr.msk.f32.vlgmr.msra.gmra.mrb[0].mxu1 %vm276_vm3, %v3946_v11  ;;  %v3538_v42 = vpop.permute.xlu1 %3537  ;;  %v380_v43 = vpop.permute.xlu0 %379 }
 0x1b2   :  { %3433 = vmatpush3.bf16.msra.mxu0 %v3432_v41  ;;  %3437 = vmatpush3.bf16.xpose.msk.msra.mxu1 %vm3986_vm4, %v3435_v40  ;;  %v3540_v44 = vunpack.i.h.bf16 %v3538_v42  ;;  %v3539_v45 = vunpack.i.l.bf16 %v3538_v42 }
 0x1b3   :  { %3102 = vmatprep.mubr.msk.f32.mxu1 %vm3783_vm0, %v3784_v1  ;;  %3112 = vmatprep.subr.mxu0 %v3784_v1 }
 0x1b4   :  { %3127 = vmatprep.subr.mxu1 %v3784_v1  ;;  %v4014_v46 = vpack.c.bf16 %v3540_v44, %v3539_v45 }
 0x1b5   :  { %3103 = vmatmul.mubr.msk.f32.gmra.mrb[2].mxu1 %vm276_vm3, %v3948_v13  ;;  %v4021_v47 = vpop.permute.xlu0 %590  ;;  %v4031_v48 = vpop.permute.xlu1 %3542 }
 0x1b6   :  { %3113 = vmatpush3.msra.mxu0 %v380_v43  ;;  %3105 = vmatprep.mubr.msk.f32.mxu1 %vm3783_vm0, %v3784_v1 }
 0x1b7   :  { %3438 = vmatprep.subr.bf16.mxu0 %v3782_v0 }
 0x1b9   :  { %3106 = vmatmul.mubr.msk.f32.gmra.mrb[4].mxu1 %vm276_vm3, %v3956_v16  ;;  %v4033_v49 = vpop.permute.xlu0 %885  ;;  %v4035_v50 = vpop.permute.xlu1 %875 }
 0x1ba   :  { %3128 = vmatpush3.xpose.msk.msra.mxu1 %vm276_vm3, %v487_v30  ;;  %3129 = vmatprep.mubr.msk.f32.mxu1 %vm3783_vm0, %v3784_v1 }
 0x1bb   :  { %3483 = vmatprep.subr.bf16.mxu1 %v3782_v0 }
 0x1bd   :  { %3130 = vmatmul.mubr.msk.f32.vlgmr.msra.gmra.mrb[6].mxu1 %vm276_vm3, %v477_v33  ;;  %v4037_v51 = vpop.permute.xlu0 %877  ;;  %v4039_v53 = vpop.permute.xlu1 %879 }
 0x1be   :  { %3485 = vmatpush3.bf16.msra.mxu1 %v4014_v46  ;;  %3132 = vmatprep.mubr.msk.f32.mxu1 %vm3783_vm0, %v3784_v1 }
 0x1bf   :  { %3484 = vmatprep.subr.mxu1 %v3784_v1 }
 0x1c1   :  { %3133 = vmatmul.mubr.msk.f32.gmra.mrb[8].mxu1 %vm276_vm3, %v479_v32 }
 0x1c2   :  { %3486 = vmatpush3.msra.mxu1 %v4021_v47  ;;  %3135 = vmatprep.mubr.msk.f32.mxu1 %vm3783_vm0, %v3784_v1 }
 0x1c3   :  { %3153 = vmatprep.subr.mxu1 %v3784_v1 }
 0x1c5   :  { %3136 = vmatmul.mubr.msk.f32.gmra.mrb[10].mxu1 %vm276_vm3, %v481_v39 }
 0x1c6   :  { %3150 = vmatprep.mubr.msk.f32.mxu1 %vm3783_vm0, %v3784_v1 }
 0x1f7   :  { %v192_v52 = vpop.xlane.xlu0 %191 }
 0x1f8   :  { %v199_v54 = vsub.f32 %v3972_v18, %v192_v52  ;;  %v183_v18 = vld [vmem:[#allocation8 + $0x8] sm:$0xff] }
 0x1f9   :  { %v265_v22 = vmul.f32 0.5, %v183_v18 }
 0x1fa   :  { %v202_v55 = vmul.f32 1.442695, %v199_v54 }
 0x1fb   :  { %v198_v56 = vpop.xlane.xlu0 %197 }
 0x1fc   :  { %3601 = vpow2.f32 %v202_v55  ;;  %v201_v57 = vsub.f32 %v3976_v20, %v198_v56  ;;  %v195_v58 = vpop.xlane.xlu1 %194 }
 0x1fd   :  { %v200_v59 = vsub.f32 %v3978_v21, %v195_v58 }
 0x1fe   :  { %v206_v60 = vmul.f32 1.442695, %v201_v57 }
 0x1ff   :  { %v204_v61 = vmul.f32 1.442695, %v200_v59 }
 0x200   :  { %3603 = vpow2.f32 %v206_v60 }
 0x201   :  { %3605 = vpow2.f32 %v204_v61 }
 0x206   :  { %v4044_v62 = vpop.eup %3601 }
 0x207   :  { %v208_v63 = vsel %vm189_vm2, %v4044_v62, 0.0 }
 0x208   :  { %209 = vadd.xlane.f32.xlu0 %v208_v63 }
 0x20a   :  { %v4048_v2 = vpop.eup %3603 }
 0x20b   :  { %v4050_v3 = vpop.eup %3605  ;;  %v214_v4 = vsel %vm189_vm2, %v4048_v2, 0.0 }
 0x20c   :  { %215 = vadd.xlane.f32.xlu0 %v214_v4  ;;  %v211_v5 = vsel %vm189_vm2, %v4050_v3, 0.0 }
 0x20d   :  { %212 = vadd.xlane.f32.xlu1 %v211_v5 }
 0x21e   :  { %3547 = vrot.lane.b32.xlu1 %v3952_v15, %s3792_s16 }
 0x222   :  { %3552 = vrot.lane.b32.xlu1 %v3952_v15, %s3793_s19  ;;  %989 = vrot.lane.b32.xlu0 %v3956_v16, %s3792_s16 }
 0x226   :  { %1191 = vrot.lane.b32.xlu1 %v3956_v16, %s3793_s19  ;;  %1181 = vrot.lane.b32.xlu0 %v3946_v11, %s3794_s20 }
 0x22a   :  { %1183 = vrot.lane.b32.xlu1 %v3948_v13, %s3794_s20  ;;  %1185 = vrot.lane.b32.xlu0 %v3956_v16, %s3794_s20 }
 0x22e   :  { %3557 = vrot.lane.b32.xlu1 %v3952_v15, %s3795_s21  ;;  %1295 = vrot.lane.b32.xlu0 %v3956_v16, %s3795_s21 }
 0x232   :  { %3562 = vrot.lane.b32.xlu1 %v3952_v15, %s3796_s0  ;;  %1500 = vrot.lane.b32.xlu0 %v3956_v16, %s3796_s0 }
 0x236   :  { %1490 = vrot.lane.b32.xlu1 %v3946_v11, %s3797_s30  ;;  %1492 = vrot.lane.b32.xlu0 %v3948_v13, %s3797_s30 }
 0x23a   :  { %1494 = vrot.lane.b32.xlu1 %v3956_v16, %s3797_s30 }
 0x255   :  { %228 = vmax.xlane.f32.xlu0 %v227_v7 }
 0x259   :  { %234 = vmax.xlane.f32.xlu0 %v233_v9 }
 0x25e   :  { %231 = vmax.xlane.f32.xlu1 %v230_v12 }
 0x284   :  { %v355_v19 = vpop.f32.mrb[0].mxu1 }
 0x285   :  { %v356_v20 = vadd.f32 %v355_v19, %v264_v17  ;;  %v3101_v21 = vpop.f32.mrb[1].mxu1 }
 0x287   :  { %v369_v24 = vmul.f32 0.98425096, %v356_v20 }
 0x288   :  { %v360_v25 = vpop.f32.mrb[2].mxu1 }
 0x289   :  { %v361_v26 = vadd.f32 %v360_v25, %v265_v22  ;;  %v3104_v27 = vpop.f32.mrb[3].mxu1  ;;  %3115 = vmatmul.mubr.msk.f32.vlgmr.msra.gmra.mrb[6].mxu0 %vm189_vm2, %v369_v24 }
 0x28a   :  { %3440 = vmatpush3.bf16.msra.mxu0 %v4014_v46  ;;  %3117 = vmatprep.mubr.msk.f32.mxu0 %vm3783_vm0, %v3784_v1 }
 0x28b   :  { %v370_v30 = vmul.f32 0.98425096, %v361_v26  ;;  %3142 = vmatprep.subr.mxu0 %v3784_v1 }
 0x28c   :  { %v365_v31 = vpop.f32.mrb[4].mxu1 }
 0x28d   :  { %v366_v32 = vadd.f32 %v365_v31, %v266_v29  ;;  %v3107_v33 = vpop.f32.mrb[5].mxu1  ;;  %3118 = vmatmul.mubr.msk.f32.gmra.mrb[8].mxu0 %vm189_vm2, %v370_v30 }
 0x28e   :  { %3143 = vmatpush3.msra.mxu0 %v4021_v47  ;;  %3120 = vmatprep.mubr.msk.f32.mxu0 %vm3783_vm0, %v3784_v1 }
 0x28f   :  { %v371_v34 = vmul.f32 0.98425096, %v366_v32  ;;  %3164 = vmatprep.subr.mxu0 %v3784_v1 }
 0x290   :  { %v566_v35 = vpop.f32.mrb[6].mxu1 }
 0x291   :  { %v567_v36 = vadd.f32 %v566_v35, %v264_v17  ;;  %3121 = vmatmul.mubr.msk.f32.gmra.mrb[10].mxu0 %vm189_vm2, %v371_v34  ;;  %v3131_v37 = vpop.f32.mrb[7].mxu1  ;;  %v260_v17 = vld [vmem:[#allocation7] sm:$0xff] }
 0x292   :  { %3144 = vmatprep.mubr.msk.f32.mxu0 %vm3783_vm0, %v3784_v1  ;;  %v688_v19 = vrot.slane %v260_v17, 4 }
 0x293   :  { %v580_v38 = vmul.f32 0.98425096, %v567_v36 }
 0x294   :  { %v571_v39 = vpop.f32.mrb[8].mxu1 }
 0x295   :  { %v4095_v40 = vadd.f32 %v580_v38, %v369_v24  ;;  %v572_v41 = vadd.f32 %v571_v39, %v265_v22  ;;  %v3134_v42 = vpop.f32.mrb[9].mxu1  ;;  %3145 = vmatmul.mubr.msk.f32.vlgmr.msra.gmra.mrb[12].mxu0 %vm189_vm2, %v580_v38  ;;  %v4110_v55 = vpop.xlane.xlu0 %209 }
 0x296   :  { %3147 = vmatprep.mubr.msk.f32.mxu0 %vm3783_vm0, %v3784_v1  ;;  %3165 = vmatpush3.msk.msra.mxu0 %vm698_vm5, %v260_v17 }
 0x297   :  { %v581_v43 = vmul.f32 0.98425096, %v572_v41  ;;  %3445 = vmatprep.subr.bf16.mxu0 %v3782_v0 }
 0x298   :  { %v576_v44 = vpop.f32.mrb[10].mxu1 }
 0x299   :  { %v4100_v45 = vadd.f32 %v581_v43, %v370_v30  ;;  %v577_v46 = vadd.f32 %v576_v44, %v266_v29  ;;  %v3137_v47 = vpop.f32.mrb[11].mxu1  ;;  %3148 = vmatmul.mubr.msk.f32.gmra.mrb[14].mxu0 %vm189_vm2, %v581_v43  ;;  %v4114_v57 = vpop.xlane.xlu0 %215  ;;  %v3545_v44 = vunpack.i.h.bf16 %v4031_v48 }
 0x29a   :  { %3166 = vmatprep.mubr.msk.f32.mxu0 %vm3783_vm0, %v3784_v1  ;;  %v4112_v56 = vpop.xlane.xlu1 %212 }
 0x29b   :  { %v582_v52 = vmul.f32 0.98425096, %v577_v46  ;;  %v3544_v46 = vunpack.i.l.bf16 %v4031_v48 }
 0x29d   :  { %v4105_v54 = vadd.f32 %v582_v52, %v371_v34  ;;  %3151 = vmatmul.mubr.msk.f32.vlgmr.msra.gmra.mrb[12].mxu1 %vm189_vm2, %v582_v52  ;;  %v4118_v59 = vpop.permute.xlu0 %989 }
 0x29e   :  { %3155 = vmatprep.mubr.msk.f32.mxu1 %vm3783_vm0, %v3784_v1  ;;  %v4116_v58 = vpop.permute.xlu1 %3547  ;;  %3154 = vmatpush3.msk.msra.mxu1 %vm698_vm5, %v688_v19 }
 0x29f   :  { %3441 = vmatprep.subr.bf16.mxu1 %v3782_v0  ;;  %v3549_v36 = vunpack.i.l.bf16 %v4116_v58 }
 0x2a1   :  { %v4122_v61 = vpop.permute.xlu0 %1181 }
 0x2a2   :  { %v4120_v60 = vpop.permute.xlu1 %3552 }
 0x2a5   :  { %v4126_v4 = vpop.permute.xlu0 %1185 }
 0x2a6   :  { %v4124_v63 = vpop.permute.xlu1 %1191 }
 0x2a9   :  { %v4130_v7 = vpop.permute.xlu0 %1295 }
 0x2aa   :  { %v4128_v5 = vpop.permute.xlu1 %1183 }
 0x2ad   :  { %v4134_v12 = vpop.permute.xlu0 %1500 }
 0x2ae   :  { %v4132_v9 = vpop.permute.xlu1 %3557 }
 0x2b1   :  { %v4138_v18 = vpop.permute.xlu0 %1492 }
 0x2b2   :  { %v4136_v14 = vpop.permute.xlu1 %3562 }
 0x2b6   :  { %v4143_v20 = vpop.permute.xlu1 %1490 }
 0x2ba   :  { %v4147_v25 = vpop.permute.xlu1 %1494 }
 0x2e2   :  { %v229_v21 = vpop.xlane.xlu0 %228 }
 0x2e3   :  { %v236_v22 = vsub.f32 %v4070_v6, %v229_v21 }
 0x2e5   :  { %v239_v23 = vmul.f32 1.442695, %v236_v22 }
 0x2e6   :  { %v235_v24 = vpop.xlane.xlu0 %234 }
 0x2e7   :  { %3607 = vpow2.f32 %v239_v23  ;;  %v238_v26 = vsub.f32 %v4074_v8, %v235_v24 }
 0x2e9   :  { %v243_v27 = vmul.f32 1.442695, %v238_v26 }
 0x2eb   :  { %3609 = vpow2.f32 %v243_v27  ;;  %v232_v29 = vpop.xlane.xlu1 %231 }
 0x2ec   :  { %v237_v30 = vsub.f32 %v4078_v10, %v232_v29  ;;  %v3550_v10 = vunpack.i.h.bf16 %v4116_v58 }
 0x2ee   :  { %v241_v31 = vmul.f32 1.442695, %v237_v30  ;;  %v3446_v41 = vpack.c.bf16 %v3550_v10, %v3549_v36 }
 0x2f0   :  { %3611 = vpow2.f32 %v241_v31 }
 0x2f1   :  { %v4151_v32 = vpop.eup %3607  ;;  %3613 = vrcp.f32 %v4110_v55 }
 0x2f2   :  { %v245_v33 = vsel %vm189_vm2, %v4151_v32, 0.0  ;;  %3615 = vrcp.f32 %v4112_v56 }
 0x2f3   :  { %246 = vadd.xlane.f32.xlu0 %v245_v33  ;;  %3617 = vrcp.f32 %v4114_v57  ;;  %v3554_v57 = vunpack.i.l.bf16 %v4120_v60 }
 0x2f5   :  { %v4155_v6 = vpop.eup %3609 }
 0x2f6   :  { %v251_v34 = vsel %vm189_vm2, %v4155_v6, 0.0 }
 0x2f7   :  { %252 = vadd.xlane.f32.xlu0 %v251_v34 }
 0x2fa   :  { %v4159_v8 = vpop.eup %3611 }
 0x2fb   :  { %v248_v35 = vsel %vm189_vm2, %v4159_v8, 0.0  ;;  %v3614_v33 = vpop.eup %3613 }
 0x2fc   :  { %249 = vadd.xlane.f32.xlu1 %v248_v35  ;;  %v218_v36 = vmul.f32 %v3614_v33, %v4044_v62 }
 0x30d   :  { %3567 = vrot.lane.b32.xlu1 %v3952_v15, %s3798_s22  ;;  %1604 = vrot.lane.b32.xlu0 %v3956_v16, %s3798_s22 }
 0x311   :  { %3572 = vrot.lane.b32.xlu1 %v3952_v15, %s3799_s23  ;;  %1796 = vrot.lane.b32.xlu0 %v3946_v11, %s3800_s24 }
 0x315   :  { %1806 = vrot.lane.b32.xlu1 %v3956_v16, %s3799_s23  ;;  %1800 = vrot.lane.b32.xlu0 %v3956_v16, %s3800_s24 }
 0x319   :  { %1798 = vrot.lane.b32.xlu1 %v3948_v13, %s3800_s24  ;;  %1910 = vrot.lane.b32.xlu0 %v3956_v16, %s3801_s25 }
 0x31d   :  { %3577 = vrot.lane.b32.xlu1 %v3952_v15, %s3801_s25  ;;  %2112 = vrot.lane.b32.xlu0 %v3956_v16, %s3802_s26 }
 0x321   :  { %3582 = vrot.lane.b32.xlu1 %v3952_v15, %s3802_s26  ;;  %2104 = vrot.lane.b32.xlu0 %v3948_v13, %s3803_s27 }
 0x325   :  { %2102 = vrot.lane.b32.xlu1 %v3946_v11, %s3803_s27  ;;  %3587 = vrot.lane.b32.xlu0 %v3952_v15, %s3804_s29 }
 0x329   :  { %2106 = vrot.lane.b32.xlu1 %v3956_v16, %s3803_s27  ;;  %3592 = vrot.lane.b32.xlu0 %v3952_v15, %s3805_s1 }
 0x32d   :  { %2216 = vrot.lane.b32.xlu1 %v3956_v16, %s3804_s29  ;;  %2408 = vrot.lane.b32.xlu0 %v3946_v11, %s3806_s28 }
 0x331   :  { %2418 = vrot.lane.b32.xlu1 %v3956_v16, %s3805_s1  ;;  %2412 = vrot.lane.b32.xlu0 %v3956_v16, %s3806_s28 }
 0x335   :  { %2410 = vrot.lane.b32.xlu1 %v3948_v13, %s3806_s28  ;;  %2522 = vrot.lane.b32.xlu0 %v3956_v16, %s3807_s2 }
 0x339   :  { %3597 = vrot.lane.b32.xlu1 %v3952_v15, %s3807_s2 }
 0x35c   :  { %v459_v37 = vpop.f32.mrb[6].mxu0 }
 0x35d   :  { %v473_v38 = vmax.f32 %v459_v37, 0.0  ;;  %v3116_v39 = vpop.f32.mrb[7].mxu0  ;;  %v3616_v37 = vpop.eup %3615 }
 0x35e   :  { %v220_v56 = vmul.f32 %v3616_v37, %v4050_v3 }
 0x35f   :  { %3167 = vmatmul.mubr.msk.f32.vlgmr.msra.gmra.mrb[16].mxu0 %vm276_vm3, %v473_v38 }
 0x360   :  { %3447 = vmatpush3.bf16.msra.mxu0 %v3446_v41  ;;  %v464_v11 = vpop.f32.mrb[8].mxu0  ;;  %3169 = vmatprep.mubr.msk.f32.mxu0 %vm3783_vm0, %v3784_v1  ;;  %v4241_v41 = vmul.f32 0.5, %v218_v36  ;;  %v4247_v62 = vmul.f32 0.5, %v220_v56 }
 0x361   :  { %v474_v13 = vmax.f32 %v464_v11, 0.0  ;;  %v3119_v42 = vpop.f32.mrb[9].mxu0  ;;  %3194 = vmatprep.subr.mxu0 %v3784_v1  ;;  %v3618_v11 = vpop.eup %3617 }
 0x363   :  { %3170 = vmatmul.mubr.msk.f32.gmra.mrb[18].mxu0 %vm276_vm3, %v474_v13  ;;  %v3555_v13 = vunpack.i.h.bf16 %v4120_v60 }
 0x364   :  { %3195 = vmatpush3.msra.mxu0 %v4118_v59  ;;  %v469_v15 = vpop.f32.mrb[10].mxu0  ;;  %3172 = vmatprep.mubr.msk.f32.mxu0 %vm3783_vm0, %v3784_v1  ;;  %v3442_v59 = vpack.c.bf16 %v3545_v44, %v3544_v46  ;;  %v222_v44 = vmul.f32 %v3618_v11, %v4048_v2 }
 0x365   :  { %v475_v16 = vmax.f32 %v469_v15, 0.0  ;;  %v3122_v43 = vpop.f32.mrb[11].mxu0  ;;  %3448 = vmatprep.subr.bf16.mxu0 %v3782_v0  ;;  %v3449_v46 = vpack.c.bf16 %v3555_v13, %v3554_v57 }
 0x367   :  { %3173 = vmatmul.mubr.msk.f32.gmra.mrb[20].mxu0 %vm276_vm3, %v475_v16 }
 0x368   :  { %v670_v47 = vpop.f32.mrb[12].mxu0  ;;  %3196 = vmatprep.mubr.msk.f32.mxu0 %vm3783_vm0, %v3784_v1 }
 0x369   :  { %v684_v52 = vmax.f32 %v670_v47, 0.0  ;;  %v3146_v58 = vpop.f32.mrb[13].mxu0 }
 0x36b   :  { %3156 = vmatmul.mubr.msk.f32.vlgmr.msra.gmra.mrb[14].mxu1 %vm276_vm3, %v684_v52 }
 0x36c   :  { %3444 = vmatpush3.bf16.xpose.msk.msra.mxu1 %vm3986_vm4, %v3442_v59  ;;  %v675_v17 = vpop.f32.mrb[14].mxu0  ;;  %3158 = vmatprep.mubr.msk.f32.mxu1 %vm3783_vm0, %v3784_v1  ;;  %v4257_v59 = vmul.f32 0.5, %v222_v44 }
 0x36d   :  { %v685_v19 = vmax.f32 %v675_v17, 0.0  ;;  %v3149_v48 = vpop.f32.mrb[15].mxu0  ;;  %3179 = vmatprep.subr.mxu1 %v3784_v1 }
 0x36f   :  { %3159 = vmatmul.mubr.msk.f32.gmra.mrb[16].mxu1 %vm276_vm3, %v685_v19 }
 0x370   :  { %v680_v21 = vpop.f32.mrb[12].mxu1  ;;  %3161 = vmatprep.mubr.msk.f32.mxu1 %vm3783_vm0, %v3784_v1 }
 0x371   :  { %v686_v22 = vmax.f32 %v680_v21, 0.0  ;;  %v3152_v23 = vpop.f32.mrb[13].mxu1 }
 0x373   :  { %3162 = vmatmul.mubr.msk.f32.gmra.mrb[18].mxu1 %vm276_vm3, %v686_v22 }
 0x374   :  { %3180 = vmatpush3.xpose.msk.msra.mxu1 %vm276_vm3, %v4033_v49  ;;  %3181 = vmatprep.mubr.msk.f32.mxu1 %vm3783_vm0, %v3784_v1  ;;  %v261_v49 = vld [vmem:[#allocation7 + $0x8] sm:$0xff] }
 0x375   :  { %3205 = vmatprep.subr.mxu1 %v3784_v1 }
 0x377   :  { %3182 = vmatmul.mubr.msk.f32.vlgmr.msra.gmra.mrb[20].mxu1 %vm276_vm3, %v4035_v50 }
 0x378   :  { %3184 = vmatprep.mubr.msk.f32.mxu1 %vm3783_vm0, %v3784_v1  ;;  %3206 = vmatpush3.msk.msra.mxu1 %vm698_vm5, %v261_v49 }
 0x379   :  { %3452 = vmatprep.subr.bf16.mxu1 %v3782_v0 }
 0x37b   :  { %3185 = vmatmul.mubr.msk.f32.gmra.mrb[22].mxu1 %vm276_vm3, %v4037_v51 }
 0x37c   :  { %3187 = vmatprep.mubr.msk.f32.mxu1 %vm3783_vm0, %v3784_v1 }
 0x37f   :  { %3188 = vmatmul.mubr.msk.f32.gmra.mrb[24].mxu1 %vm276_vm3, %v4039_v53 }
 0x380   :  { %3207 = vmatprep.mubr.msk.f32.mxu1 %vm3783_vm0, %v3784_v1 }
 0x432   :  { %v858_v50 = vpop.f32.mrb[16].mxu0 }
 0x433   :  { %v3168_v24 = vpop.f32.mrb[17].mxu0 }
 0x436   :  { %v863_v26 = vpop.f32.mrb[18].mxu0 }
 0x437   :  { %v3171_v27 = vpop.f32.mrb[19].mxu0 }
 0x438   :  { %v3565_v27 = vunpack.i.h.bf16 %v4136_v14 }
 0x43a   :  { %v868_v51 = vpop.f32.mrb[20].mxu0 }
 0x43b   :  { %v3174_v29 = vpop.f32.mrb[21].mxu0 }
 0x43e   :  { %v767_v30 = vpop.f32.mrb[14].mxu1 }
 0x43f   :  { %v4233_v53 = vadd.f32 %v858_v50, %v767_v30  ;;  %v3157_v31 = vpop.f32.mrb[15].mxu1 }
 0x442   :  { %v772_v34 = vpop.f32.mrb[16].mxu1 }
 0x443   :  { %v4236_v35 = vadd.f32 %v863_v26, %v772_v34  ;;  %v3160_v10 = vpop.f32.mrb[17].mxu1 }
 0x446   :  { %v777_v38 = vpop.f32.mrb[18].mxu1 }
 0x447   :  { %v4239_v55 = vadd.f32 %v868_v51, %v777_v38  ;;  %v3163_v39 = vpop.f32.mrb[19].mxu1  ;;  %v3564_v51 = vunpack.i.l.bf16 %v4136_v14 }
 0x449   :  { %v3456_v33 = vpack.c.bf16 %v3565_v27, %v3564_v51 }
 0x44a   :  { %v965_v42 = vpop.f32.mrb[20].mxu1 }
 0x44b   :  { %v966_v15 = vadd.f32 %v965_v42, %v4241_v41  ;;  %v3183_v16 = vpop.f32.mrb[21].mxu1  ;;  %v250_v42 = vpop.xlane.xlu1 %249 }
 0x44d   :  { %v979_v43 = vmul.f32 0.98425096, %v966_v15 }
 0x44e   :  { %v970_v47 = vpop.f32.mrb[22].mxu1 }
 0x44f   :  { %v982_v52 = vadd.f32 %v979_v43, %v4095_v40  ;;  %v971_v3 = vadd.f32 %v970_v47, %v4247_v62  ;;  %v3186_v58 = vpop.f32.mrb[23].mxu1  ;;  %3197 = vmatmul.mubr.msk.f32.vlgmr.msra.gmra.mrb[22].mxu0 %vm189_vm2, %v979_v43  ;;  %v247_v43 = vpop.xlane.xlu0 %246 }
 0x450   :  { %3451 = vmatpush3.bf16.xpose.msk.msra.mxu0 %vm3986_vm4, %v3449_v46  ;;  %3199 = vmatprep.mubr.msk.f32.mxu0 %vm3783_vm0, %v3784_v1  ;;  %3619 = vrcp.f32 %v247_v43  ;;  %v3568_v44 = vpop.permute.xlu1 %3567 }
 0x451   :  { %v980_v60 = vmul.f32 0.98425096, %v971_v3  ;;  %3220 = vmatprep.subr.mxu0 %v3784_v1  ;;  %3621 = vrcp.f32 %v250_v42  ;;  %v3570_v47 = vunpack.i.h.bf16 %v3568_v44 }
 0x452   :  { %v975_v2 = vpop.f32.mrb[24].mxu1 }
 0x453   :  { %v983_v17 = vadd.f32 %v980_v60, %v4100_v45  ;;  %v976_v40 = vadd.f32 %v975_v2, %v4257_v59  ;;  %v3189_v19 = vpop.f32.mrb[25].mxu1  ;;  %3200 = vmatmul.mubr.msk.f32.gmra.mrb[24].mxu0 %vm189_vm2, %v980_v60  ;;  %v1392_v45 = vrot.slane %v261_v49, 4  ;;  %v253_v3 = vpop.xlane.xlu0 %252 }
 0x454   :  { %3202 = vmatprep.mubr.msk.f32.mxu0 %vm3783_vm0, %v3784_v1  ;;  %3623 = vrcp.f32 %v253_v3 }
 0x455   :  { %v981_v48 = vmul.f32 0.98425096, %v976_v40 }
 0x457   :  { %v984_v21 = vadd.f32 %v981_v48, %v4105_v54  ;;  %3203 = vmatmul.mubr.msk.f32.gmra.mrb[26].mxu0 %vm189_vm2, %v981_v48  ;;  %v3560_v54 = vunpack.i.h.bf16 %v4132_v9  ;;  %v1605_v40 = vpop.permute.xlu0 %1604 }
 0x458   :  { %3221 = vmatpush3.xpose.msk.msra.mxu0 %vm276_vm3, %v4124_v63  ;;  %3222 = vmatprep.mubr.msk.f32.mxu0 %vm3783_vm0, %v3784_v1 }
 0x459   :  { %3246 = vmatprep.subr.mxu0 %v3784_v1 }
 0x45b   :  { %3223 = vmatmul.mubr.msk.f32.vlgmr.msra.gmra.mrb[28].mxu0 %vm276_vm3, %v4122_v61  ;;  %v3559_v61 = vunpack.i.l.bf16 %v4132_v9 }
 0x45c   :  { %3225 = vmatprep.mubr.msk.f32.mxu0 %vm3783_vm0, %v3784_v1  ;;  %3247 = vmatpush3.msk.msra.mxu0 %vm698_vm5, %v1392_v45  ;;  %v3573_v45 = vpop.permute.xlu1 %3572 }
 0x45d   :  { %3459 = vmatprep.subr.bf16.mxu0 %v3782_v0  ;;  %v3453_v49 = vpack.c.bf16 %v3560_v54, %v3559_v61 }
 0x45f   :  { %3226 = vmatmul.mubr.msk.f32.gmra.mrb[30].mxu0 %vm276_vm3, %v4128_v5 }
 0x460   :  { %3228 = vmatprep.mubr.msk.f32.mxu0 %vm3783_vm0, %v3784_v1 }
 0x463   :  { %3229 = vmatmul.mubr.msk.f32.gmra.mrb[32].mxu0 %vm276_vm3, %v4126_v4 }
 0x464   :  { %3248 = vmatprep.mubr.msk.f32.mxu0 %vm3783_vm0, %v3784_v1 }
 0x522   :  { %v1069_v63 = vpop.f32.mrb[22].mxu0 }
 0x523   :  { %v1083_v22 = vmax.f32 %v1069_v63, 0.0  ;;  %v3198_v23 = vpop.f32.mrb[23].mxu0 }
 0x525   :  { %3208 = vmatmul.mubr.msk.f32.vlgmr.msra.gmra.mrb[26].mxu1 %vm276_vm3, %v1083_v22 }
 0x526   :  { %3454 = vmatpush3.bf16.msra.mxu1 %v3453_v49  ;;  %v1074_v5 = vpop.f32.mrb[24].mxu0  ;;  %3210 = vmatprep.mubr.msk.f32.mxu1 %vm3783_vm0, %v3784_v1  ;;  %v3575_v49 = vunpack.i.h.bf16 %v3573_v45 }
 0x527   :  { %v1084_v50 = vmax.f32 %v1074_v5, 0.0  ;;  %v3201_v4 = vpop.f32.mrb[25].mxu0  ;;  %3235 = vmatprep.subr.mxu1 %v3784_v1 }
 0x529   :  { %3211 = vmatmul.mubr.msk.f32.gmra.mrb[28].mxu1 %vm276_vm3, %v1084_v50 }
 0x52a   :  { %3236 = vmatpush3.msra.mxu1 %v4130_v7  ;;  %v1079_v9 = vpop.f32.mrb[26].mxu0  ;;  %3213 = vmatprep.mubr.msk.f32.mxu1 %vm3783_vm0, %v3784_v1 }
 0x52b   :  { %v1085_v24 = vmax.f32 %v1079_v9, 0.0  ;;  %v3204_v26 = vpop.f32.mrb[27].mxu0  ;;  %3455 = vmatprep.subr.bf16.mxu1 %v3782_v0 }
 0x52d   :  { %3214 = vmatmul.mubr.msk.f32.gmra.mrb[30].mxu1 %vm276_vm3, %v1085_v24 }
 0x52e   :  { %v1271_v29 = vpop.f32.mrb[28].mxu0  ;;  %3237 = vmatprep.mubr.msk.f32.mxu1 %vm3783_vm0, %v3784_v1 }
 0x52f   :  { %v1272_v7 = vadd.f32 %v1271_v29, %v4241_v41  ;;  %v3224_v30 = vpop.f32.mrb[29].mxu0 }
 0x531   :  { %v1285_v31 = vmul.f32 0.98425096, %v1272_v7 }
 0x532   :  { %v1276_v34 = vpop.f32.mrb[30].mxu0 }
 0x533   :  { %v4303_v10 = vadd.f32 %v1285_v31, %v982_v52  ;;  %v1277_v36 = vadd.f32 %v1276_v34, %v4247_v62  ;;  %v3227_v37 = vpop.f32.mrb[31].mxu0  ;;  %3238 = vmatmul.mubr.msk.f32.vlgmr.msra.gmra.mrb[32].mxu1 %vm189_vm2, %v1285_v31  ;;  %v3569_v52 = vunpack.i.l.bf16 %v3568_v44 }
 0x534   :  { %3458 = vmatpush3.bf16.xpose.msk.msra.mxu1 %vm3986_vm4, %v3456_v33  ;;  %3240 = vmatprep.mubr.msk.f32.mxu1 %vm3783_vm0, %v3784_v1  ;;  %v1807_v37 = vpop.permute.xlu1 %1806 }
 0x535   :  { %v1286_v14 = vmul.f32 0.98425096, %v1277_v36  ;;  %3261 = vmatprep.subr.mxu1 %v3784_v1 }
 0x536   :  { %v1281_v38 = vpop.f32.mrb[32].mxu0 }
 0x537   :  { %v4312_v39 = vadd.f32 %v1286_v14, %v983_v17  ;;  %v1282_v41 = vadd.f32 %v1281_v38, %v4257_v59  ;;  %v3230_v56 = vpop.f32.mrb[33].mxu0  ;;  %3241 = vmatmul.mubr.msk.f32.gmra.mrb[34].mxu1 %vm189_vm2, %v1286_v14  ;;  %v3460_v59 = vpack.c.bf16 %v3570_v47, %v3569_v52  ;;  %v1797_v38 = vpop.permute.xlu0 %1796 }
 0x538   :  { %3243 = vmatprep.mubr.msk.f32.mxu1 %vm3783_vm0, %v3784_v1  ;;  %v262_v56 = vld [vmem:[#allocation7 + $0x10] sm:$0xff] }
 0x539   :  { %v1287_v11 = vmul.f32 0.98425096, %v1282_v41 }
 0x53b   :  { %v4318_v13 = vadd.f32 %v1287_v11, %v984_v21  ;;  %3244 = vmatmul.mubr.msk.f32.gmra.mrb[36].mxu1 %vm189_vm2, %v1287_v11  ;;  %v1801_v41 = vpop.permute.xlu0 %1800  ;;  %v2007_v11 = vrot.slane %v262_v56, 4 }
 0x53c   :  { %3262 = vmatpush3.xpose.msk.msra.mxu1 %vm276_vm3, %v4134_v12  ;;  %3263 = vmatprep.mubr.msk.f32.mxu1 %vm3783_vm0, %v3784_v1 }
 0x53d   :  { %3287 = vmatprep.subr.mxu1 %v3784_v1 }
 0x53f   :  { %3264 = vmatmul.mubr.msk.f32.vlgmr.msra.gmra.mrb[38].mxu1 %vm276_vm3, %v4143_v20 }
 0x540   :  { %3266 = vmatprep.mubr.msk.f32.mxu1 %vm3783_vm0, %v3784_v1  ;;  %3288 = vmatpush3.msk.msra.mxu1 %vm698_vm5, %v262_v56 }
 0x541   :  { %3466 = vmatprep.subr.bf16.mxu1 %v3782_v0 }
 0x543   :  { %3267 = vmatmul.mubr.msk.f32.gmra.mrb[40].mxu1 %vm276_vm3, %v4138_v18 }
 0x544   :  { %3269 = vmatprep.mubr.msk.f32.mxu1 %vm3783_vm0, %v3784_v1 }
 0x547   :  { %3270 = vmatmul.mubr.msk.f32.gmra.mrb[42].mxu1 %vm276_vm3, %v4147_v25 }
 0x548   :  { %3289 = vmatprep.mubr.msk.f32.mxu1 %vm3783_vm0, %v3784_v1 }
 0x5f8   :  { %v1164_v12 = vpop.f32.mrb[26].mxu1 }
 0x5f9   :  { %v4339_v57 = vadd.f32 %v1164_v12, %v4233_v53  ;;  %v3209_v20 = vpop.f32.mrb[27].mxu1 }
 0x5fc   :  { %v1169_v15 = vpop.f32.mrb[28].mxu1 }
 0x5fd   :  { %v4342_v16 = vadd.f32 %v1169_v15, %v4236_v35  ;;  %v3212_v18 = vpop.f32.mrb[29].mxu1  ;;  %v3620_v35 = vpop.eup %3619 }
 0x5fe   :  { %v255_v19 = vmul.f32 %v3620_v35, %v4151_v32  ;;  %v3622_v48 = vpop.eup %3621  ;;  %v3574_v32 = vunpack.i.l.bf16 %v3573_v45 }
 0x5ff   :  { %v257_v22 = vmul.f32 %v3622_v48, %v4159_v8  ;;  %v3624_v23 = vpop.eup %3623 }
 0x600   :  { %v1174_v62 = vpop.f32.mrb[30].mxu1  ;;  %v4357_v63 = vmul.f32 0.5, %v255_v19  ;;  %v259_v26 = vmul.f32 %v3624_v23, %v4155_v6  ;;  %v3463_v27 = vpack.c.bf16 %v3575_v49, %v3574_v32 }
 0x601   :  { %v4345_v25 = vadd.f32 %v1174_v62, %v4239_v55  ;;  %v3215_v46 = vpop.f32.mrb[31].mxu1  ;;  %v4363_v24 = vmul.f32 0.5, %v257_v22 }
 0x602   :  { %v4375_v31 = vmul.f32 0.5, %v259_v26 }
 0x606   :  { %v1375_v53 = vpop.f32.mrb[32].mxu1 }
 0x607   :  { %v1389_v58 = vmax.f32 %v1375_v53, 0.0  ;;  %v3239_v60 = vpop.f32.mrb[33].mxu1 }
 0x609   :  { %3249 = vmatmul.mubr.msk.f32.vlgmr.msra.gmra.mrb[34].mxu0 %vm276_vm3, %v1389_v58 }
 0x60a   :  { %3461 = vmatpush3.bf16.msra.mxu0 %v3460_v59  ;;  %v1380_v2 = vpop.f32.mrb[34].mxu1  ;;  %3251 = vmatprep.mubr.msk.f32.mxu0 %vm3783_vm0, %v3784_v1 }
 0x60b   :  { %v1390_v55 = vmax.f32 %v1380_v2, 0.0  ;;  %v3242_v17 = vpop.f32.mrb[35].mxu1  ;;  %3276 = vmatprep.subr.mxu0 %v3784_v1 }
 0x60d   :  { %3252 = vmatmul.mubr.msk.f32.gmra.mrb[36].mxu0 %vm276_vm3, %v1390_v55 }
 0x60e   :  { %3277 = vmatpush3.msra.mxu0 %v1605_v40  ;;  %v1385_v21 = vpop.f32.mrb[36].mxu1  ;;  %3254 = vmatprep.mubr.msk.f32.mxu0 %vm3783_vm0, %v3784_v1 }
 0x60f   :  { %v1391_v54 = vmax.f32 %v1385_v21, 0.0  ;;  %v3245_v61 = vpop.f32.mrb[37].mxu1  ;;  %3462 = vmatprep.subr.bf16.mxu0 %v3782_v0 }
 0x611   :  { %3255 = vmatmul.mubr.msk.f32.gmra.mrb[38].mxu0 %vm276_vm3, %v1391_v54 }
 0x612   :  { %v1580_v5 = vpop.f32.mrb[38].mxu1  ;;  %3278 = vmatprep.mubr.msk.f32.mxu0 %vm3783_vm0, %v3784_v1 }
 0x613   :  { %v1581_v50 = vadd.f32 %v1580_v5, %v4357_v63  ;;  %v3265_v4 = vpop.f32.mrb[39].mxu1 }
 0x615   :  { %v1594_v9 = vmul.f32 0.98425096, %v1581_v50 }
 0x616   :  { %v1585_v51 = vpop.f32.mrb[40].mxu1 }
 0x617   :  { %v4367_v29 = vadd.f32 %v1594_v9, %v4303_v10  ;;  %v1586_v8 = vadd.f32 %v1585_v51, %v4363_v24  ;;  %v3268_v7 = vpop.f32.mrb[41].mxu1  ;;  %3279 = vmatmul.mubr.msk.f32.vlgmr.msra.gmra.mrb[40].mxu0 %vm189_vm2, %v1594_v9 }
 0x618   :  { %3465 = vmatpush3.bf16.xpose.msk.msra.mxu0 %vm3986_vm4, %v3463_v27  ;;  %3281 = vmatprep.mubr.msk.f32.mxu0 %vm3783_vm0, %v3784_v1 }
 0x619   :  { %v1595_v30 = vmul.f32 0.98425096, %v1586_v8  ;;  %3302 = vmatprep.subr.mxu0 %v3784_v1 }
 0x61a   :  { %v1590_v6 = vpop.f32.mrb[42].mxu1 }
 0x61b   :  { %v4379_v33 = vadd.f32 %v1595_v30, %v4312_v39  ;;  %v1591_v34 = vadd.f32 %v1590_v6, %v4375_v31  ;;  %v3271_v10 = vpop.f32.mrb[43].mxu1  ;;  %3282 = vmatmul.mubr.msk.f32.gmra.mrb[42].mxu0 %vm189_vm2, %v1595_v30  ;;  %v1799_v39 = vpop.permute.xlu1 %1798 }
 0x61c   :  { %3284 = vmatprep.mubr.msk.f32.mxu0 %vm3783_vm0, %v3784_v1 }
 0x61d   :  { %v1596_v36 = vmul.f32 0.98425096, %v1591_v34 }
 0x61f   :  { %v4386_v14 = vadd.f32 %v1596_v36, %v4318_v13  ;;  %3285 = vmatmul.mubr.msk.f32.gmra.mrb[44].mxu0 %vm189_vm2, %v1596_v36  ;;  %v3578_v62 = vpop.permute.xlu1 %3577 }
 0x620   :  { %3303 = vmatpush3.xpose.msk.msra.mxu0 %vm276_vm3, %v1807_v37  ;;  %3304 = vmatprep.mubr.msk.f32.mxu0 %vm3783_vm0, %v3784_v1  ;;  %v3580_v47 = vunpack.i.h.bf16 %v3578_v62  ;;  %v3579_v52 = vunpack.i.l.bf16 %v3578_v62 }
 0x621   :  { %3328 = vmatprep.subr.mxu0 %v3784_v1 }
 0x622   :  { %v3467_v60 = vpack.c.bf16 %v3580_v47, %v3579_v52 }
 0x623   :  { %3305 = vmatmul.mubr.msk.f32.vlgmr.msra.gmra.mrb[46].mxu0 %vm276_vm3, %v1797_v38  ;;  %v3583_v2 = vpop.permute.xlu1 %3582 }
 0x624   :  { %3307 = vmatprep.mubr.msk.f32.mxu0 %vm3783_vm0, %v3784_v1  ;;  %3329 = vmatpush3.msk.msra.mxu0 %vm698_vm5, %v2007_v11  ;;  %v3585_v40 = vunpack.i.h.bf16 %v3583_v2  ;;  %v3584_v19 = vunpack.i.l.bf16 %v3583_v2 }
 0x625   :  { %3473 = vmatprep.subr.bf16.mxu0 %v3782_v0 }
 0x626   :  { %v3470_v61 = vpack.c.bf16 %v3585_v40, %v3584_v19 }
 0x627   :  { %3308 = vmatmul.mubr.msk.f32.gmra.mrb[48].mxu0 %vm276_vm3, %v1799_v39  ;;  %v2103_v51 = vpop.permute.xlu1 %2102 }
 0x628   :  { %3310 = vmatprep.mubr.msk.f32.mxu0 %vm3783_vm0, %v3784_v1 }
 0x62b   :  { %3311 = vmatmul.mubr.msk.f32.gmra.mrb[50].mxu0 %vm276_vm3, %v1801_v41  ;;  %v2107_v8 = vpop.permute.xlu1 %2106 }
 0x62c   :  { %3330 = vmatprep.mubr.msk.f32.mxu0 %vm3783_vm0, %v3784_v1 }
 0x6dc   :  { %v1470_v13 = vpop.f32.mrb[34].mxu0 }
 0x6dd   :  { %v4407_v12 = vadd.f32 %v1470_v13, %v4339_v57  ;;  %v3250_v20 = vpop.f32.mrb[35].mxu0 }
 0x6e0   :  { %v1475_v42 = vpop.f32.mrb[36].mxu0 }
 0x6e1   :  { %v4410_v15 = vadd.f32 %v1475_v42, %v4342_v16  ;;  %v3253_v18 = vpop.f32.mrb[37].mxu0 }
 0x6e2   :  { %v2217_v18 = vpop.permute.xlu1 %2216 }
 0x6e4   :  { %v1480_v43 = vpop.f32.mrb[38].mxu0 }
 0x6e5   :  { %v4413_v44 = vadd.f32 %v1480_v43, %v4345_v25  ;;  %v3256_v46 = vpop.f32.mrb[39].mxu0  ;;  %v1911_v25 = vpop.permute.xlu0 %1910 }
 0x6e9   :  { %v2113_v26 = vpop.permute.xlu0 %2112 }
 0x6ea   :  { %v1684_v53 = vpop.f32.mrb[40].mxu0 }
 0x6eb   :  { %v1698_v3 = vmax.f32 %v1684_v53, 0.0  ;;  %v3280_v58 = vpop.f32.mrb[41].mxu0 }
 0x6ed   :  { %3290 = vmatmul.mubr.msk.f32.vlgmr.msra.gmra.mrb[44].mxu1 %vm276_vm3, %v1698_v3 }
 0x6ee   :  { %3468 = vmatpush3.bf16.msra.mxu1 %v3467_v60  ;;  %v1689_v57 = vpop.f32.mrb[42].mxu0  ;;  %3292 = vmatprep.mubr.msk.f32.mxu1 %vm3783_vm0, %v3784_v1 }
 0x6ef   :  { %v1699_v16 = vmax.f32 %v1689_v57, 0.0  ;;  %v3283_v59 = vpop.f32.mrb[43].mxu0  ;;  %3317 = vmatprep.subr.mxu1 %v3784_v1 }
 0x6f1   :  { %3293 = vmatmul.mubr.msk.f32.gmra.mrb[46].mxu1 %vm276_vm3, %v1699_v16 }
 0x6f2   :  { %3318 = vmatpush3.msra.mxu1 %v1911_v25  ;;  %v1694_v35 = vpop.f32.mrb[44].mxu0  ;;  %3295 = vmatprep.mubr.msk.f32.mxu1 %vm3783_vm0, %v3784_v1 }
 0x6f3   :  { %v1700_v55 = vmax.f32 %v1694_v35, 0.0  ;;  %v3286_v17 = vpop.f32.mrb[45].mxu0  ;;  %3469 = vmatprep.subr.bf16.mxu1 %v3782_v0 }
 0x6f5   :  { %3296 = vmatmul.mubr.msk.f32.gmra.mrb[48].mxu1 %vm276_vm3, %v1700_v55  ;;  %v2419_v55 = vpop.permute.xlu1 %2418 }
 0x6f6   :  { %v1886_v48 = vpop.f32.mrb[46].mxu0  ;;  %3319 = vmatprep.mubr.msk.f32.mxu1 %vm3783_vm0, %v3784_v1 }
 0x6f7   :  { %v1887_v21 = vadd.f32 %v1886_v48, %v4357_v63  ;;  %v3306_v45 = vpop.f32.mrb[47].mxu0 }
 0x6f9   :  { %v1900_v54 = vmul.f32 0.98425096, %v1887_v21  ;;  %v2411_v19 = vpop.permute.xlu1 %2410  ;;  %v263_v21 = vld [vmem:[#allocation7 + $0x18] sm:$0xff] }
 0x6fa   :  { %v1891_v22 = vpop.f32.mrb[48].mxu0  ;;  %v2619_v45 = vrot.slane %v263_v21, 4 }
 0x6fb   :  { %v4428_v23 = vadd.f32 %v1900_v54, %v4367_v29  ;;  %v1892_v49 = vadd.f32 %v1891_v22, %v4363_v24  ;;  %v3309_v32 = vpop.f32.mrb[49].mxu0  ;;  %3320 = vmatmul.mubr.msk.f32.vlgmr.msra.gmra.mrb[50].mxu1 %vm189_vm2, %v1900_v54  ;;  %v2105_v29 = vpop.permute.xlu0 %2104 }
 0x6fc   :  { %3472 = vmatpush3.bf16.xpose.msk.msra.mxu1 %vm3986_vm4, %v3470_v61  ;;  %3322 = vmatprep.mubr.msk.f32.mxu1 %vm3783_vm0, %v3784_v1 }
 0x6fd   :  { %v1901_v5 = vmul.f32 0.98425096, %v1892_v49  ;;  %3343 = vmatprep.subr.mxu1 %v3784_v1 }
 0x6fe   :  { %v1896_v63 = vpop.f32.mrb[50].mxu0 }
 0x6ff   :  { %v4438_v50 = vadd.f32 %v1901_v5, %v4379_v33  ;;  %v1897_v4 = vadd.f32 %v1896_v63, %v4375_v31  ;;  %v3312_v9 = vpop.f32.mrb[51].mxu0  ;;  %3323 = vmatmul.mubr.msk.f32.gmra.mrb[52].mxu1 %vm189_vm2, %v1901_v5  ;;  %v3588_v36 = vpop.permute.xlu0 %3587 }
 0x700   :  { %3325 = vmatprep.mubr.msk.f32.mxu1 %vm3783_vm0, %v3784_v1  ;;  %v3590_v38 = vunpack.i.h.bf16 %v3588_v36  ;;  %v3589_v39 = vunpack.i.l.bf16 %v3588_v36  ;;  %v3598_v5 = vpop.permute.xlu1 %3597 }
 0x701   :  { %v1902_v24 = vmul.f32 0.98425096, %v1897_v4  ;;  %v3600_v9 = vunpack.i.h.bf16 %v3598_v5 }
 0x702   :  { %v3474_v13 = vpack.c.bf16 %v3590_v38, %v3589_v39 }
 0x703   :  { %v4445_v27 = vadd.f32 %v1902_v24, %v4386_v14  ;;  %3326 = vmatmul.mubr.msk.f32.gmra.mrb[54].mxu1 %vm189_vm2, %v1902_v24  ;;  %v3599_v24 = vunpack.i.l.bf16 %v3598_v5 }
 0x704   :  { %3344 = vmatpush3.xpose.msk.msra.mxu1 %vm276_vm3, %v2113_v26  ;;  %3345 = vmatprep.mubr.msk.f32.mxu1 %vm3783_vm0, %v3784_v1 }
 0x705   :  { %3369 = vmatprep.subr.mxu1 %v3784_v1 }
 0x707   :  { %3346 = vmatmul.mubr.msk.f32.vlgmr.msra.gmra.mrb[56].mxu1 %vm276_vm3, %v2103_v51  ;;  %v3481_v51 = vpack.c.bf16 %v3600_v9, %v3599_v24 }
 0x708   :  { %3348 = vmatprep.mubr.msk.f32.mxu1 %vm3783_vm0, %v3784_v1  ;;  %3370 = vmatpush3.msk.msra.mxu1 %vm698_vm5, %v263_v21 }
 0x709   :  { %3480 = vmatprep.subr.bf16.mxu1 %v3782_v0 }
 0x70b   :  { %3349 = vmatmul.mubr.msk.f32.gmra.mrb[58].mxu1 %vm276_vm3, %v2105_v29 }
 0x70c   :  { %3351 = vmatprep.mubr.msk.f32.mxu1 %vm3783_vm0, %v3784_v1 }
 0x70f   :  { %3352 = vmatmul.mubr.msk.f32.gmra.mrb[60].mxu1 %vm276_vm3, %v2107_v8 }
 0x710   :  { %3371 = vmatprep.mubr.msk.f32.mxu1 %vm3783_vm0, %v3784_v1 }
 0x7c0   :  { %v1779_v7 = vpop.f32.mrb[44].mxu1 }
 0x7c1   :  { %v4462_v30 = vadd.f32 %v1779_v7, %v4407_v12  ;;  %v3291_v31 = vpop.f32.mrb[45].mxu1 }
 0x7c4   :  { %v1784_v6 = vpop.f32.mrb[46].mxu1 }
 0x7c5   :  { %v4465_v33 = vadd.f32 %v1784_v6, %v4410_v15  ;;  %v3294_v34 = vpop.f32.mrb[47].mxu1  ;;  %v3593_v15 = vpop.permute.xlu0 %3592 }
 0x7c6   :  { %v3595_v46 = vunpack.i.h.bf16 %v3593_v15  ;;  %v3594_v47 = vunpack.i.l.bf16 %v3593_v15 }
 0x7c8   :  { %v1789_v10 = vpop.f32.mrb[48].mxu1  ;;  %v3477_v58 = vpack.c.bf16 %v3595_v46, %v3594_v47 }
 0x7c9   :  { %v4468_v37 = vadd.f32 %v1789_v10, %v4413_v44  ;;  %v3297_v14 = vpop.f32.mrb[49].mxu1  ;;  %v2409_v40 = vpop.permute.xlu0 %2408 }
 0x7cd   :  { %v2413_v48 = vpop.permute.xlu0 %2412 }
 0x7ce   :  { %v1990_v41 = vpop.f32.mrb[50].mxu1 }
 0x7cf   :  { %v2004_v56 = vmax.f32 %v1990_v41, 0.0  ;;  %v3321_v11 = vpop.f32.mrb[51].mxu1 }
 0x7d1   :  { %3331 = vmatmul.mubr.msk.f32.vlgmr.msra.gmra.mrb[52].mxu0 %vm276_vm3, %v2004_v56 }
 0x7d2   :  { %3475 = vmatpush3.bf16.msra.mxu0 %v3474_v13  ;;  %v1995_v12 = vpop.f32.mrb[52].mxu1  ;;  %3333 = vmatprep.mubr.msk.f32.mxu0 %vm3783_vm0, %v3784_v1 }
 0x7d3   :  { %v2005_v20 = vmax.f32 %v1995_v12, 0.0  ;;  %v3324_v42 = vpop.f32.mrb[53].mxu1  ;;  %3358 = vmatprep.subr.mxu0 %v3784_v1 }
 0x7d5   :  { %3334 = vmatmul.mubr.msk.f32.gmra.mrb[54].mxu0 %vm276_vm3, %v2005_v20 }
 0x7d6   :  { %3359 = vmatpush3.msra.mxu0 %v2217_v18  ;;  %v2000_v43 = vpop.f32.mrb[54].mxu1  ;;  %3336 = vmatprep.mubr.msk.f32.mxu0 %vm3783_vm0, %v3784_v1 }
 0x7d7   :  { %v2006_v62 = vmax.f32 %v2000_v43, 0.0  ;;  %v3327_v44 = vpop.f32.mrb[55].mxu1  ;;  %3476 = vmatprep.subr.bf16.mxu0 %v3782_v0 }
 0x7d9   :  { %3337 = vmatmul.mubr.msk.f32.gmra.mrb[56].mxu0 %vm276_vm3, %v2006_v62 }
 0x7da   :  { %v2192_v52 = vpop.f32.mrb[56].mxu1  ;;  %3360 = vmatprep.mubr.msk.f32.mxu0 %vm3783_vm0, %v3784_v1 }
 0x7db   :  { %v2206_v53 = vmul.f32 0.98425096, %v2192_v52  ;;  %v3347_v3 = vpop.f32.mrb[57].mxu1 }
 0x7dd   :  { %v4482_v60 = vadd.f32 %v2206_v53, %v4428_v23  ;;  %3361 = vmatmul.mubr.msk.f32.vlgmr.msra.gmra.mrb[58].mxu0 %vm189_vm2, %v2206_v53 }
 0x7de   :  { %3479 = vmatpush3.bf16.xpose.msk.msra.mxu0 %vm3986_vm4, %v3477_v58  ;;  %v2197_v57 = vpop.f32.mrb[58].mxu1  ;;  %3363 = vmatprep.mubr.msk.f32.mxu0 %vm3783_vm0, %v3784_v1 }
 0x7df   :  { %v2207_v16 = vmul.f32 0.98425096, %v2197_v57  ;;  %v3350_v59 = vpop.f32.mrb[59].mxu1  ;;  %3384 = vmatprep.subr.mxu0 %v3784_v1 }
 0x7e1   :  { %v4491_v25 = vadd.f32 %v2207_v16, %v4438_v50  ;;  %3364 = vmatmul.mubr.msk.f32.gmra.mrb[60].mxu0 %vm189_vm2, %v2207_v16 }
 0x7e2   :  { %v2202_v35 = vpop.f32.mrb[60].mxu1  ;;  %3366 = vmatprep.mubr.msk.f32.mxu0 %vm3783_vm0, %v3784_v1 }
 0x7e3   :  { %v2208_v2 = vmul.f32 0.98425096, %v2202_v35  ;;  %v3353_v28 = vpop.f32.mrb[61].mxu1 }
 0x7e5   :  { %v4497_v17 = vadd.f32 %v2208_v2, %v4445_v27  ;;  %3367 = vmatmul.mubr.msk.f32.gmra.mrb[62].mxu0 %vm189_vm2, %v2208_v2 }
 0x7e6   :  { %3385 = vmatpush3.xpose.msk.msra.mxu0 %vm276_vm3, %v2419_v55  ;;  %3386 = vmatprep.mubr.msk.f32.mxu0 %vm3783_vm0, %v3784_v1 }
 0x7e7   :  { %3410 = vmatprep.subr.mxu0 %v3784_v1 }
 0x7e9   :  { %3387 = vmatmul.mubr.msk.f32.vlgmr.msra.gmra.mrb[64].mxu0 %vm276_vm3, %v2409_v40 }
 0x7ea   :  { %3389 = vmatprep.mubr.msk.f32.mxu0 %vm3783_vm0, %v3784_v1  ;;  %3411 = vmatpush3.msk.msra.mxu0 %vm698_vm5, %v2619_v45 }
 0x7ed   :  { %3390 = vmatmul.mubr.msk.f32.gmra.mrb[66].mxu0 %vm276_vm3, %v2411_v19  ;;  %v2938_v19 = vld [vmem:[%s4600_s3] ss:$0 sm:$0xff]  ;;  %s3808_s3 = smov [#allocation11]  }
 0x7ee   :  { %3392 = vmatprep.mubr.msk.f32.mxu0 %vm3783_vm0, %v3784_v1  ;;  %s2813_s10 = sshll.u32 %s3808_s3, 4  ;;  %s2814_s10 = int_to_ptr.vmem [resolvable:$true] %s2813_s10 }
 0x7ef   :  { %s3722_s11 = scalar_lea.vmem %s2814_s10, 384  ;;  %p3727_p5 = scmp.lt.s32.totalorder %s2814_s10, %s2814_s10 }
 0x7f0   :  { %p3723_p4 = scmp.ne.s32.totalorder %s2814_s10, %s3722_s11  ;;  %p3728_p6 = scmp.lt.s32.totalorder %s3722_s11, %s3722_s11 }
 0x7f1   :  { %3393 = vmatmul.mubr.msk.f32.gmra.mrb[68].mxu0 %vm276_vm3, %v2413_v48  ;;  %v3631_v48 = vld [vmem:[#allocation2] sm:$0xff] }
 0x7f2   :  { %3412 = vmatprep.mubr.msk.f32.mxu0 %vm3783_vm0, %v3784_v1  ;;  %p3729_p7 = por %p3728_p6, %p3727_p5 }
 0x7f4   :  { %p3730_p8 = pnand %p3729_p7, %p3723_p4 }
 0x8a4   :  { %v2085_v54 = vpop.f32.mrb[52].mxu0 }
 0x8a5   :  { %v2099_v61 = vadd.f32 %v2085_v54, %v4462_v30  ;;  %v3332_v22 = vpop.f32.mrb[53].mxu0  ;;  %v2523_v30 = vpop.permute.xlu0 %2522 }
 0x8a8   :  { %v2090_v23 = vpop.f32.mrb[54].mxu0 }
 0x8a9   :  { %v2100_v49 = vadd.f32 %v2090_v23, %v4465_v33  ;;  %v3335_v32 = vpop.f32.mrb[55].mxu0  ;;  %v3632_v23 = vld [vmem:[#allocation2 + $0x8] sm:$0xff] }
 0x8ac   :  { %v2095_v63 = vpop.f32.mrb[56].mxu0 }
 0x8ad   :  { %v2101_v50 = vadd.f32 %v2095_v63, %v4468_v37  ;;  %v3338_v4 = vpop.f32.mrb[57].mxu0 }
 0x8ae   :  { %v3633_v4 = vld [vmem:[#allocation2 + $0x10] sm:$0xff] }
 0x8b0   :  { %v2296_v26 = vpop.f32.mrb[58].mxu0 }
 0x8b1   :  { %v2310_v27 = vmax.f32 %v2296_v26, 0.0  ;;  %v3362_v0 = vpop.f32.mrb[59].mxu0 }
 0x8b3   :  { %3372 = vmatmul.mubr.msk.f32.vlgmr.msra.gmra.mrb[62].mxu1 %vm276_vm3, %v2310_v27 }
 0x8b4   :  { %3482 = vmatpush3.bf16.msra.mxu1 %v3481_v51  ;;  %v2301_v29 = vpop.f32.mrb[60].mxu0  ;;  %3374 = vmatprep.mubr.msk.f32.mxu1 %vm3783_vm0, %v3784_v1 }
 0x8b5   :  { %v2311_v8 = vmax.f32 %v2301_v29, 0.0  ;;  %v3365_v7 = vpop.f32.mrb[61].mxu0  ;;  %3399 = vmatprep.subr.mxu1 %v3784_v1 }
 0x8b7   :  { %3375 = vmatmul.mubr.msk.f32.gmra.mrb[64].mxu1 %vm276_vm3, %v2311_v8 }
 0x8b8   :  { %3400 = vmatpush3.msra.mxu1 %v2523_v30  ;;  %v2306_v31 = vpop.f32.mrb[62].mxu0  ;;  %3377 = vmatprep.mubr.msk.f32.mxu1 %vm3783_vm0, %v3784_v1 }
 0x8b9   :  { %v2312_v6 = vmax.f32 %v2306_v31, 0.0  ;;  %v3368_v33 = vpop.f32.mrb[63].mxu0 }
 0x8bb   :  { %3378 = vmatmul.mubr.msk.f32.gmra.mrb[66].mxu1 %vm276_vm3, %v2312_v6 }
 0x8bc   :  { %v2498_v34 = vpop.f32.mrb[64].mxu0  ;;  %3401 = vmatprep.mubr.msk.f32.mxu1 %vm3783_vm0, %v3784_v1 }
 0x8bd   :  { %v2512_v10 = vmul.f32 0.98425096, %v2498_v34  ;;  %v3388_v36 = vpop.f32.mrb[65].mxu0 }
 0x8bf   :  { %v2515_v37 = vadd.f32 %v2512_v10, %v4482_v60  ;;  %3402 = vmatmul.mubr.msk.f32.vlgmr.msra.gmra.mrb[68].mxu1 %vm189_vm2, %v2512_v10 }
 0x8c0   :  { %v2503_v14 = vpop.f32.mrb[66].mxu0  ;;  %3404 = vmatprep.mubr.msk.f32.mxu1 %vm3783_vm0, %v3784_v1 }
 0x8c1   :  { %v2790_v38 = vmul.f32 0.125, %v2515_v37  ;;  %v2513_v39 = vmul.f32 0.98425096, %v2503_v14  ;;  %v3391_v41 = vpop.f32.mrb[67].mxu0 }
 0x8c3   :  { %2793 = vst.msk [vmem:[#allocation11] sm:$0xff] %vm189_vm2, %v2790_v38  ;;  %v2516_v56 = vadd.f32 %v2513_v39, %v4491_v25  ;;  %3405 = vmatmul.mubr.msk.f32.gmra.mrb[70].mxu1 %vm189_vm2, %v2513_v39 }
 0x8c4   :  { %v2508_v11 = vpop.f32.mrb[68].mxu0  ;;  %3407 = vmatprep.mubr.msk.f32.mxu1 %vm3783_vm0, %v3784_v1 }
 0x8c5   :  { %v2791_v13 = vmul.f32 0.125, %v2516_v56  ;;  %v2514_v12 = vmul.f32 0.98425096, %v2508_v11  ;;  %v3394_v20 = vpop.f32.mrb[69].mxu0 }
 0x8c7   :  { %2794 = vst.msk [vmem:[#allocation11 + $0x8] sm:$0xff] %vm189_vm2, %v2791_v13  ;;  %v2517_v42 = vadd.f32 %v2514_v12, %v4497_v17  ;;  %3408 = vmatmul.mubr.msk.f32.gmra.mrb[72].mxu1 %vm189_vm2, %v2514_v12 }
 0x8c9   :  { %v2792_v15 = vmul.f32 0.125, %v2517_v42 }
 0x8cb   :  { %2795 = vst.msk [vmem:[#allocation11 + $0x10] sm:$0xff] %vm189_vm2, %v2792_v15 }
 0x986   :  { %v2391_v18 = vpop.f32.mrb[62].mxu1 }
 0x987   :  { %v2405_v43 = vadd.f32 %v2391_v18, %v2099_v61  ;;  %v3373_v62 = vpop.f32.mrb[63].mxu1 }
 0x98a   :  { %v2396_v44 = vpop.f32.mrb[64].mxu1 }
 0x98b   :  { %v2406_v46 = vadd.f32 %v2396_v44, %v2100_v49  ;;  %v3376_v47 = vpop.f32.mrb[65].mxu1 }
 0x98e   :  { %v2401_v52 = vpop.f32.mrb[66].mxu1 }
 0x98f   :  { %v2407_v53 = vadd.f32 %v2401_v52, %v2101_v50  ;;  %v3379_v3 = vpop.f32.mrb[67].mxu1 }
 0x992   :  { %v2602_v58 = vpop.f32.mrb[68].mxu1 }
 0x993   :  { %v2616_v60 = vmax.f32 %v2602_v58, 0.0  ;;  %v3403_v57 = vpop.f32.mrb[69].mxu1 }
 0x995   :  { %3413 = vmatmul.mubr.msk.f32.vlgmr.msra.gmra.mrb[70].mxu0 %vm276_vm3, %v2616_v60 }
 0x996   :  { %v2607_v16 = vpop.f32.mrb[70].mxu1  ;;  %3415 = vmatprep.mubr.msk.f32.mxu0 %vm3783_vm0, %v3784_v1 }
 0x997   :  { %v2617_v59 = vmax.f32 %v2607_v16, 0.0  ;;  %v3406_v25 = vpop.f32.mrb[71].mxu1 }
 0x999   :  { %3416 = vmatmul.mubr.msk.f32.gmra.mrb[72].mxu0 %vm276_vm3, %v2617_v59 }
 0x99a   :  { %v2612_v35 = vpop.f32.mrb[72].mxu1  ;;  %3418 = vmatprep.mubr.msk.f32.mxu0 %vm3783_vm0, %v3784_v1 }
 0x99b   :  { %v2618_v2 = vmax.f32 %v2612_v35, 0.0  ;;  %v3409_v28 = vpop.f32.mrb[73].mxu1 }
 0x99d   :  { %3419 = vmatmul.mubr.msk.f32.gmra.mrb[74].mxu0 %vm276_vm3, %v2618_v2 }
 0xa68   :  { %v2697_v55 = vpop.f32.mrb[70].mxu0 }
 0xa69   :  { %v2711_v17 = vadd.f32 %v2697_v55, %v2405_v43  ;;  %v3414_v40 = vpop.f32.mrb[71].mxu0 }
 0xa6b   :  { %v2714_v21 = vadd.f32 %v3631_v48, %v2711_v17 }
 0xa6c   :  { %v2702_v45 = vpop.f32.mrb[72].mxu0 }
 0xa6d   :  { %v2712_v54 = vadd.f32 %v2702_v45, %v2406_v46  ;;  %v3417_v61 = vpop.f32.mrb[73].mxu0  ;;  %v2724_v22 = vadd.f32 %v2938_v19, %v2714_v21 }
 0xa6f   :  { %v2715_v49 = vadd.f32 %v3632_v23, %v2712_v54  ;;  %v2727_v1 = vsel %vm92_vm1, %v2724_v22, 0.0 }
 0xa70   :  { %2728 = vadd.xlane.f32.xlu1 %v2727_v1  ;;  %v2707_v32 = vpop.f32.mrb[74].mxu0 }
 0xa71   :  { %v2713_v5 = vadd.f32 %v2707_v32, %v2407_v53  ;;  %v3420_v63 = vpop.f32.mrb[75].mxu0  ;;  %v2725_v50 = vadd.f32 %v2938_v19, %v2715_v49 }
 0xa73   :  { %v2716_v9 = vadd.f32 %v3633_v4, %v2713_v5  ;;  %v2730_v24 = vsel %vm92_vm1, %v2725_v50, 0.0 }
 0xa74   :  { %2731 = vadd.xlane.f32.xlu0 %v2730_v24 }
 0xa75   :  { %v2726_v26 = vadd.f32 %v2938_v19, %v2716_v9 }
 0xa77   :  { %v2733_v27 = vsel %vm92_vm1, %v2726_v26, 0.0 }
 0xa78   :  { %2734 = vadd.xlane.f32.xlu0 %v2733_v27 }
 0xafd   :  { %v2729_v0 = vpop.xlane.xlu1 %2728 }
 0xafe   :  { %v2737_v51 = vmul.f32 0.03125, %v2729_v0 }
 0xb00   :  { %v2740_v29 = vsub.f32 %v2724_v22, %v2737_v51 }
 0xb01   :  { %v2732_v8 = vpop.xlane.xlu0 %2731 }
 0xb02   :  { %v2738_v7 = vmul.f32 0.03125, %v2732_v8  ;;  %v2743_v30 = vmul.f32 %v2740_v29, %v2740_v29 }
 0xb04   :  { %v2741_v31 = vsub.f32 %v2725_v50, %v2738_v7  ;;  %v2746_v6 = vsel %vm92_vm1, %v2743_v30, 0.0 }
 0xb05   :  { %2747 = vadd.xlane.f32.xlu1 %v2746_v6  ;;  %v2735_v33 = vpop.xlane.xlu0 %2734 }
 0xb06   :  { %v2739_v34 = vmul.f32 0.03125, %v2735_v33  ;;  %v2744_v10 = vmul.f32 %v2741_v31, %v2741_v31 }
 0xb08   :  { %v2742_v36 = vsub.f32 %v2726_v26, %v2739_v34  ;;  %v2749_v37 = vsel %vm92_vm1, %v2744_v10, 0.0 }
 0xb09   :  { %2750 = vadd.xlane.f32.xlu0 %v2749_v37 }
 0xb0a   :  { %v2745_v14 = vmul.f32 %v2742_v36, %v2742_v36 }
 0xb0c   :  { %v2752_v38 = vsel %vm92_vm1, %v2745_v14, 0.0 }
 0xb0d   :  { %2753 = vadd.xlane.f32.xlu1 %v2752_v38 }
 0xb0e   :  { %3733 = shalt.err (!%p3730_p8)
}
 0xb0f   :  { %s3734_s14 = scalar_lea.hbm %s4605_s8, 384 }
 0xb10   :  { %p3735_p9 = scmp.ne.s32.totalorder %s4605_s8, %s3734_s14  ;;  %p3738_p10 = scmp.lt.u32.totalorder %s3734_s14, %s4605_s8 }
 0xb12   :  { %p3740_p11 = pnand %p3738_p10, %p3735_p9 }
 0xb14   :  { %3743 = shalt.err (!%p3740_p11)
}
 0xb15   :  { %2819 = dma.vmem_to_hbm [thread:$0]  %s2814_s10, 384, %s4605_s8, [#allocation12], %s3778_s17, %s3778_s17, %s3779_s18  }
 0xb16   :  { %v2939_v43 = vld [vmem:[%s4601_s4] ss:$0 sm:$0xff]  ;;  %s3809_s24 = smov [#allocation10]  }
 0xb17   :  { %v2940_v44 = vld [vmem:[%s4602_s5] ss:$0 sm:$0xff]  ;;  %s2801_s25 = sshll.u32 %s3809_s24, 4  ;;  %s2802_s25 = int_to_ptr.vmem [resolvable:$true] %s2801_s25 }
 0xb18   :  { %s3744_s4 = scalar_lea.vmem %s2802_s25, 384  ;;  %p3749_p13 = scmp.lt.s32.totalorder %s2802_s25, %s2802_s25 }
 0xb19   :  { %p3745_p12 = scmp.ne.s32.totalorder %s2802_s25, %s3744_s4  ;;  %p3750_p0 = scmp.lt.s32.totalorder %s3744_s4, %s3744_s4 }
 0xb1b   :  { %p3751_p1 = por %p3750_p0, %p3749_p13 }
 0xb1d   :  { %p3752_p2 = pnand %p3751_p1, %p3745_p12 }
 0xb92   :  { %v2748_v39 = vpop.xlane.xlu1 %2747 }
 0xb93   :  { %v2755_v41 = vmul.f32 0.03125, %v2748_v39 }
 0xb95   :  { %v2758_v56 = vadd.f32 1e-05, %v2755_v41 }
 0xb96   :  { %v2751_v11 = vpop.xlane.xlu0 %2750 }
 0xb97   :  { %3625 = vrsqrt.f32 %v2758_v56  ;;  %v2756_v13 = vmul.f32 0.03125, %v2751_v11 }
 0xb99   :  { %v2759_v12 = vadd.f32 1e-05, %v2756_v13 }
 0xb9a   :  { %v2754_v20 = vpop.xlane.xlu1 %2753 }
 0xb9b   :  { %3627 = vrsqrt.f32 %v2759_v12  ;;  %v2757_v42 = vmul.f32 0.03125, %v2754_v20 }
 0xb9d   :  { %v2760_v15 = vadd.f32 1e-05, %v2757_v42 }
 0xb9f   :  { %3629 = vrsqrt.f32 %v2760_v15 }
 0xba1   :  { %v3626_v18 = vpop.eup %3625 }
 0xba2   :  { %v2764_v62 = vmul.f32 %v3626_v18, %v2740_v29 }
 0xba4   :  { %v2774_v46 = vmul.f32 %v2939_v43, %v2764_v62 }
 0xba5   :  { %v3628_v47 = vpop.eup %3627 }
 0xba6   :  { %v2765_v52 = vmul.f32 %v3628_v47, %v2741_v31  ;;  %v2784_v53 = vadd.f32 %v2940_v44, %v2774_v46 }
 0xba8   :  { %v2775_v3 = vmul.f32 %v2939_v43, %v2765_v52  ;;  %2787 = vst.msk [vmem:[#allocation10] sm:$0xff] %vm92_vm1, %v2784_v53 }
 0xba9   :  { %v3630_v58 = vpop.eup %3629 }
 0xbaa   :  { %v2766_v60 = vmul.f32 %v3630_v58, %v2742_v36  ;;  %v2785_v57 = vadd.f32 %v2940_v44, %v2775_v3 }
 0xbac   :  { %v2776_v16 = vmul.f32 %v2939_v43, %v2766_v60  ;;  %2788 = vst.msk [vmem:[#allocation10 + $0x8] sm:$0xff] %vm92_vm1, %v2785_v57 }
 0xbae   :  { %v2786_v59 = vadd.f32 %v2940_v44, %v2776_v16 }
 0xbb0   :  { %2789 = vst.msk [vmem:[#allocation10 + $0x10] sm:$0xff] %vm92_vm1, %v2786_v59 }
 0xbb1   :  { %3755 = shalt.err (!%p3752_p2)
}
 0xbb2   :  { %s3756_s27 = scalar_lea.hbm %s4604_s7, 384 }
 0xbb3   :  { %p3757_p3 = scmp.ne.s32.totalorder %s4604_s7, %s3756_s27  ;;  %p3760_p4 = scmp.lt.u32.totalorder %s3756_s27, %s4604_s7 }
 0xbb5   :  { %p3762_p5 = pnand %p3760_p4, %p3757_p3 }
 0xbb7   :  { %3765 = shalt.err (!%p3762_p5)
}
 0xbb8   :  { %2807 = dma.vmem_to_hbm [thread:$0]  %s2802_s25, 384, %s4604_s7, [#allocation4], %s3778_s17, %s3778_s17, %s3779_s18  }
 0xbb9   :  { %3772 = dma.done.wait [#allocation4], 384  }
 0xbba   :  { %3773 = vsyncadd [#allocation4], 4294966912 }
 0xbbb   :  { %3774 = dma.done.wait [#allocation12], 384  }
 0xbbc   :  { %3775 = vsyncadd [#allocation12], 4294966912 }
 0xbbd   :  { %2826 = vsyncpa [#allocation3], 1 }
 0xbbe   :  { %2827 = vsyncpa [#allocation6], 1 }
 0xbbf   :  { %2828 = vsyncpa [#allocation9], 1 }
 0xbc0   :  { %2829 = vsyncpa [#allocation4], 1 }
 0xbc1   :  { %2830 = vsyncpa [#allocation12], 1 }

</bundles_post_ra>
